<compile_context>
chip_gen: v7x
topology: tpu7x:2x2x1
jax: 0.10.0
libtpu: 0.0.40
codegen_flags: <defaults>
</compile_context>

<pallas_src>
import math

import jax
import jax.numpy as jnp
from jax.experimental import pallas as pl
from jax.experimental.pallas import tpu as pltpu

C_IN = 19
C_IN_PAD = 32          # channel pad 19 -> 32 so conv1 im2col taps are 32-lane aligned
NUM_CLASSES = 1
BN_EPS = 1e-5          # PyTorch BatchNorm1d default eps
K1, K2, K3 = 7, 5, 3
P1, P2, P3 = 3, 2, 1
C1, C2, C3 = 32, 64, 128
FC_DIM = 128


# ---------------------------------------------------------------------------
# Kernel helpers
# ---------------------------------------------------------------------------
def _im2col_strided(pad_ref, first_row, ksize, n_out):
    """Gather `ksize` conv taps for every *stride-2* output row (the 2:1
    maxpool is fused into the matmul) from a zero-haloed padded activation
    staged in VMEM, lane-concatenate them, and cast to bf16 for the MXU.

    pad_ref : VMEM ref [Bt, L_in + ksize - 1, C] (f32, halo rows are zero)
    returns : bf16 value [Bt * n_out, ksize * C]
    """
    bt, _, c = pad_ref.shape
    cols = jnp.concatenate(
        [pad_ref[:, pl.ds(first_row + t, n_out, stride=2), :] for t in range(ksize)],
        axis=-1)                                      # [Bt, n_out, ksize*C] f32
    return cols.reshape(bt * n_out, ksize * c).astype(jnp.bfloat16)


# ---------------------------------------------------------------------------
# Fused kernel: conv1..3 (+BN+ReLU+maxpool) + avg-pool + fc1 + ReLU + fc2
# ---------------------------------------------------------------------------
def _eeg_cnn_kernel(xe_ref, xo_ref,
                    w1_ref, b1_ref, w2_ref, b2_ref, w3_ref, b3_ref,
                    fw1_ref, fb1_ref, fw2_ref, fb2_ref,
                    out_ref,
                    pad2_ref, pad3_ref):
    bt, l1, f1 = xe_ref.shape          # l1 = L // 2 (post-pool1 length)
    l2, l3 = l1 // 2, l1 // 4

    # ---- conv1 + BN + ReLU + maxpool(2,2) -----------------------------------
    # Wrapper pre-built the lane-aligned im2col operand split into even/odd
    # output rows, so the pool is just an elementwise max of two matmuls.
    w1 = w1_ref[...]
    ye = jnp.dot(xe_ref[...].reshape(bt * l1, f1), w1,
                 preferred_element_type=jnp.float32)
    yo = jnp.dot(xo_ref[...].reshape(bt * l1, f1), w1,
                 preferred_element_type=jnp.float32)
    h1 = jnp.maximum(jnp.maximum(ye, yo) + b1_ref[...], 0.0)     # [Bt*l1, C1] f32

    # Stage conv2's padded input (per-sample zero halo -> no cross-sample leak).
    pad2_ref[:, 0:P2, :] = jnp.zeros((bt, P2, C1), jnp.float32)
    pad2_ref[:, P2 + l1:P2 + l1 + P2, :] = jnp.zeros((bt, P2, C1), jnp.float32)
    pad2_ref[:, P2:P2 + l1, :] = h1.reshape(bt, l1, C1)

    # ---- conv2 + BN + ReLU + maxpool(2,2) -----------------------------------
    w2 = w2_ref[...]
    ye = jnp.dot(_im2col_strided(pad2_ref, 0, K2, l2), w2,
                 preferred_element_type=jnp.float32)
    yo = jnp.dot(_im2col_strided(pad2_ref, 1, K2, l2), w2,
                 preferred_element_type=jnp.float32)
    h2 = jnp.maximum(jnp.maximum(ye, yo) + b2_ref[...], 0.0)     # [Bt*l2, C2] f32

    pad3_ref[:, 0:P3, :] = jnp.zeros((bt, P3, C2), jnp.float32)
    pad3_ref[:, P3 + l2:P3 + l2 + P3, :] = jnp.zeros((bt, P3, C2), jnp.float32)
    pad3_ref[:, P3:P3 + l2, :] = h2.reshape(bt, l2, C2)

    # ---- conv3 + BN + ReLU + maxpool(2,2) -----------------------------------
    w3 = w3_ref[...]
    ye = jnp.dot(_im2col_strided(pad3_ref, 0, K3, l3), w3,
                 preferred_element_type=jnp.float32)
    yo = jnp.dot(_im2col_strided(pad3_ref, 1, K3, l3), w3,
                 preferred_element_type=jnp.float32)
    h3 = jnp.maximum(jnp.maximum(ye, yo) + b3_ref[...], 0.0)     # [Bt*l3, C3] f32

    # ---- head: AdaptiveAvgPool1d(1) + fc1 + ReLU + fc2 ----------------------
    feat = jnp.sum(h3.reshape(bt, l3, C3), axis=1) * (1.0 / l3)  # [Bt, C3] f32
    z = jnp.dot(feat.astype(jnp.bfloat16), fw1_ref[...],
                preferred_element_type=jnp.float32) + fb1_ref[...]
    z = jnp.maximum(z, 0.0)
    # TODO(synk): nn.Dropout(0.5) is identity in eval mode; training-mode RNG
    # dropout is not implemented here.
    # fc2 (output width 1): lane reduction instead of an N=1 MXU matmul.
    logits = jnp.sum(z * fw2_ref[...], axis=-1, keepdims=True) + fb2_ref[...]
    out_ref[0] = logits                                          # [Bt, 1]


# ---------------------------------------------------------------------------
# Wrapper-side weight / input preparation (constant-folded under jit)
# ---------------------------------------------------------------------------
def _fold_bn_into_conv(w, conv_b, gamma, beta, mean, var, c_in_pad=None):
    """PyTorch conv weight [C_out, C_in, K] -> im2col [K*C_in(_pad), C_out] with
    the BatchNorm1d(eval) scale folded in.  Returns (bf16 weight, f32 bias)."""
    c_out, c_in, k = w.shape
    scale = gamma / jnp.sqrt(var + BN_EPS)                       # [C_out]
    bias = (conv_b - mean) * scale + beta                        # [C_out]
    wt = jnp.transpose(w, (2, 1, 0)).astype(jnp.float32)         # [K, C_in, C_out]
    if c_in_pad is not None and c_in_pad > c_in:
        wt = jnp.pad(wt, ((0, 0), (0, c_in_pad - c_in), (0, 0)))
        c_in = c_in_pad
    w_flat = (wt * scale[None, None, :]).reshape(k * c_in, c_out).astype(jnp.bfloat16)
    return w_flat, bias.reshape(1, c_out).astype(jnp.float32)


def _prep_params(params):
    w1, b1 = _fold_bn_into_conv(params['conv1_w'], params['conv1_b'],
                                params['bn1_gamma'], params['bn1_beta'],
                                params['bn1_mean'], params['bn1_var'],
                                c_in_pad=C_IN_PAD)
    w2, b2 = _fold_bn_into_conv(params['conv2_w'], params['conv2_b'],
                                params['bn2_gamma'], params['bn2_beta'],
                                params['bn2_mean'], params['bn2_var'])
    w3, b3 = _fold_bn_into_conv(params['conv3_w'], params['conv3_b'],
                                params['bn3_gamma'], params['bn3_beta'],
                                params['bn3_mean'], params['bn3_var'])
    fw1 = jnp.transpose(params['fc1_w']).astype(jnp.bfloat16)        # [128, 128]
    fb1 = params['fc1_b'].reshape(1, FC_DIM).astype(jnp.float32)
    fw2 = params['fc2_w'].reshape(NUM_CLASSES, FC_DIM).astype(jnp.float32)  # [1,128]
    fb2 = params['fc2_b'].reshape(1, NUM_CLASSES).astype(jnp.float32)
    return w1, b1, w2, b2, w3, b3, fw1, fb1, fw2, fb2


def _normalize_input(x):
    """Same layout handling as EEG_CNN.forward; returns channels-last [B, L, C_IN]."""
    if x.shape[1] == C_IN and x.shape[2] != C_IN:
        x_bcl = x
    elif x.shape[2] == C_IN and x.shape[1] != C_IN:
        x_bcl = jnp.transpose(x, (0, 2, 1))
    else:
        raise ValueError(
            f"Input tensor shape {x.shape} is ambiguous or does not match "
            f"input_channels {C_IN}")
    return jnp.transpose(x_bcl, (0, 2, 1)).astype(jnp.float32)


def _conv1_im2col_even_odd(x_blc):
    """Build conv1's im2col operand on the XLA side (channels zero-padded
    19->32), pre-split into even / odd conv-output rows, cast to bf16."""
    b, l, _ = x_blc.shape
    xp = jnp.pad(x_blc, ((0, 0), (P1, P1), (0, C_IN_PAD - C_IN)))
    cols = jnp.concatenate([xp[:, t:t + l, :] for t in range(K1)], axis=-1)
    cols = cols.astype(jnp.bfloat16)                              # [B, L, K1*32]
    return cols[:, 0::2, :], cols[:, 1::2, :]                     # [B, L//2, 224] x2


# ---------------------------------------------------------------------------
# Forward
# ---------------------------------------------------------------------------
def eeg_cnn_forward(params, x, block_b=8):
    x_blc = _normalize_input(x)
    b, l, _ = x_blc.shape
    assert l % 64 == 0, "sequence length must be divisible by 64 (3x 2:1 pools " \
                        "+ in-kernel sublane reshapes); pad the sequence if needed"

    bt = max(1, min(block_b, b))
    nb = pl.cdiv(b, bt)
    b_pad = nb * bt
    if b_pad != b:
        x_blc = jnp.pad(x_blc, ((0, b_pad - b), (0, 0), (0, 0)))

    xe, xo = _conv1_im2col_even_odd(x_blc)       # each [b_pad, l//2, K1*C_IN_PAD] bf16
    w1, b1, w2, b2, w3, b3, fw1, fb1, fw2, fb2 = _prep_params(params)

    l1, l2 = l // 2, l // 4
    f1 = K1 * C_IN_PAD
    _const = lambda i: (0, 0)

    out = pl.pallas_call(
        _eeg_cnn_kernel,
        out_shape=jax.ShapeDtypeStruct((nb, bt, NUM_CLASSES), jnp.float32),
        grid_spec=pltpu.PrefetchScalarGridSpec(
            num_scalar_prefetch=0,
            grid=(nb,),
            in_specs=[
                pl.BlockSpec((bt, l1, f1), lambda i: (i, 0, 0)),      # conv1 even rows
                pl.BlockSpec((bt, l1, f1), lambda i: (i, 0, 0)),      # conv1 odd rows
                pl.BlockSpec((f1, C1), _const),
                pl.BlockSpec((1, C1), _const),
                pl.BlockSpec((K2 * C1, C2), _const),
                pl.BlockSpec((1, C2), _const),
                pl.BlockSpec((K3 * C2, C3), _const),
                pl.BlockSpec((1, C3), _const),
                pl.BlockSpec((FC_DIM, FC_DIM), _const),
                pl.BlockSpec((1, FC_DIM), _const),
                pl.BlockSpec((NUM_CLASSES, FC_DIM), _const),
                pl.BlockSpec((1, NUM_CLASSES), _const),
            ],
            out_specs=pl.BlockSpec((1, bt, NUM_CLASSES), lambda i: (i, 0, 0)),
            scratch_shapes=[
                # Padded (haloed) staging buffers for conv2 / conv3 inputs.
                pltpu.VMEM((bt, l1 + 2 * P2, C1), jnp.float32),
                pltpu.VMEM((bt, l2 + 2 * P3, C2), jnp.float32),
            ],
        ),
        compiler_params=pltpu.CompilerParams(
            dimension_semantics=("parallel",),
            vmem_limit_bytes=32 * 1024 * 1024),
    )(xe, xo, w1, b1, w2, b2, w3, b3, fw1, fb1, fw2, fb2)

    return out.reshape(b_pad, NUM_CLASSES)[:b]


# ---------------------------------------------------------------------------
# Pure-JAX reference mirroring the kernel numerics (bf16 matmul operands,
# f32 accumulation, folded BN, f32 bias/ReLU/pool) for a correctness check.
# ---------------------------------------------------------------------------
def _reference_forward(params, x):
    x_blc = _normalize_input(x)
    w1, b1, w2, b2, w3, b3, fw1, fb1, fw2, fb2 = _prep_params(params)

    def conv_block(h, w_flat, bias, ksize, pad):
        bb, ll, _ = h.shape
        hp = jnp.pad(h, ((0, 0), (pad, pad), (0, 0)))
        cols = jnp.concatenate([hp[:, t:t + ll, :] for t in range(ksize)], axis=-1)
        y = jnp.einsum('blf,fo->blo', cols.astype(jnp.bfloat16), w_flat,
                       preferred_element_type=jnp.float32)
        y = jnp.maximum(y + bias.reshape(1, 1, -1), 0.0)
        return y.reshape(bb, ll // 2, 2, -1).max(axis=2)          # f32 pooled

    h = jnp.pad(x_blc, ((0, 0), (0, 0), (0, C_IN_PAD - C_IN)))    # channel pad 19->32
    h = conv_block(h, w1, b1, K1, P1)
    h = conv_block(h, w2, b2, K2, P2)
    h = conv_block(h, w3, b3, K3, P3)
    feat = jnp.mean(h, axis=1)                                    # [B, 128] f32
    z = jnp.maximum(jnp.dot(feat.astype(jnp.bfloat16), fw1,
                            preferred_element_type=jnp.float32) + fb1, 0.0)
    return jnp.sum(z * fw2, axis=-1, keepdims=True) + fb2         # [B, 1]


# ---------------------------------------------------------------------------
# Parameters (deterministic, PyTorch-default-style init; BN in eval mode)
# ---------------------------------------------------------------------------
def init_params(key):
    def conv_init(k, c_out, c_in, ksize):
        kw, kb = jax.random.split(k)
        bound = 1.0 / math.sqrt(c_in * ksize)
        w = jax.random.uniform(kw, (c_out, c_in, ksize), jnp.float32, -bound, bound)
        b = jax.random.uniform(kb, (c_out,), jnp.float32, -bound, bound)
        return w, b

    def linear_init(k, out_f, in_f):
        kw, kb = jax.random.split(k)
        bound = 1.0 / math.sqrt(in_f)
        w = jax.random.uniform(kw, (out_f, in_f), jnp.float32, -bound, bound)
        b = jax.random.uniform(kb, (out_f,), jnp.float32, -bound, bound)
        return w, b

    ks = jax.random.split(key, 5)
    p = {}
    p['conv1_w'], p['conv1_b'] = conv_init(ks[0], C1, C_IN, K1)
    p['conv2_w'], p['conv2_b'] = conv_init(ks[1], C2, C1, K2)
    p['conv3_w'], p['conv3_b'] = conv_init(ks[2], C3, C2, K3)
    for i, c in zip((1, 2, 3), (C1, C2, C3)):
        p[f'bn{i}_gamma'] = jnp.ones((c,), jnp.float32)
        p[f'bn{i}_beta'] = jnp.zeros((c,), jnp.float32)
        p[f'bn{i}_mean'] = jnp.zeros((c,), jnp.float32)
        p[f'bn{i}_var'] = jnp.ones((c,), jnp.float32)
    p['fc1_w'], p['fc1_b'] = linear_init(ks[3], FC_DIM, FC_DIM)
    p['fc2_w'], p['fc2_b'] = linear_init(ks[4], NUM_CLASSES, FC_DIM)
    return p


if __name__ == "__main__":
    key = jax.random.PRNGKey(0)
    pkey, xkey = jax.random.split(key)
    params = init_params(pkey)

    B, L = 2, 128  # small demo shapes; L divisible by 64 (three 2:1 pools)
    x = jax.random.normal(xkey, (B, L, C_IN), jnp.float32)  # [B, seq, channels]

    fwd = jax.jit(lambda inp: eeg_cnn_forward(params, inp))
    logits = fwd(x)
    jax.block_until_ready(logits)

    assert logits.shape == (B, NUM_CLASSES)
    assert bool(jnp.all(jnp.isfinite(logits)))

    ref = _reference_forward(params, x)
    assert bool(jnp.allclose(logits, ref, atol=5e-3, rtol=5e-3)), \
        f"mismatch vs reference: {logits} vs {ref}"

    print("KERNEL_OK")
</pallas_src>

<mosaic_0001>
module attributes {stable_mosaic.version = 11 : i64} {
  func.func @_eeg_cnn_kernel(%arg0: i32, %arg1: memref<2x64x224xbf16, #tpu.memory_space<vmem>>, %arg2: memref<2x64x224xbf16, #tpu.memory_space<vmem>>, %arg3: memref<224x32xbf16, #tpu.memory_space<vmem>>, %arg4: memref<1x32xf32, #tpu.memory_space<vmem>>, %arg5: memref<160x64xbf16, #tpu.memory_space<vmem>>, %arg6: memref<1x64xf32, #tpu.memory_space<vmem>>, %arg7: memref<192x128xbf16, #tpu.memory_space<vmem>>, %arg8: memref<1x128xf32, #tpu.memory_space<vmem>>, %arg9: memref<128x128xbf16, #tpu.memory_space<vmem>>, %arg10: memref<1x128xf32, #tpu.memory_space<vmem>>, %arg11: memref<1x128xf32, #tpu.memory_space<vmem>>, %arg12: memref<1x1xf32, #tpu.memory_space<vmem>>, %arg13: memref<1x2x1xf32, #tpu.memory_space<vmem>>, %arg14: memref<2x68x32xf32, #tpu.memory_space<vmem>>, %arg15: memref<2x34x64xf32, #tpu.memory_space<vmem>>) attributes {dimension_semantics = [#tpu.dimension_semantics<parallel>], iteration_bounds = array<i64: 1>, scalar_prefetch = 0 : i64, scratch_operands = 2 : i64, tpu.core_type = #tpu.core_type<tc>, window_params = [{transform_indices = @transform_0, window_bounds = array<i64: 2, 64, 224>}, {transform_indices = @transform_1, window_bounds = array<i64: 2, 64, 224>}, {pipeline_mode = #tpu.pipeline_mode<synchronous>, transform_indices = @transform_2, window_bounds = array<i64: 224, 32>}, {pipeline_mode = #tpu.pipeline_mode<synchronous>, transform_indices = @transform_3, window_bounds = array<i64: 1, 32>}, {pipeline_mode = #tpu.pipeline_mode<synchronous>, transform_indices = @transform_4, window_bounds = array<i64: 160, 64>}, {pipeline_mode = #tpu.pipeline_mode<synchronous>, transform_indices = @transform_5, window_bounds = array<i64: 1, 64>}, {pipeline_mode = #tpu.pipeline_mode<synchronous>, transform_indices = @transform_6, window_bounds = array<i64: 192, 128>}, {pipeline_mode = #tpu.pipeline_mode<synchronous>, transform_indices = @transform_7, window_bounds = array<i64: 1, 128>}, {pipeline_mode = #tpu.pipeline_mode<synchronous>, transform_indices = @transform_8, window_bounds = array<i64: 128, 128>}, {pipeline_mode = #tpu.pipeline_mode<synchronous>, transform_indices = @transform_9, window_bounds = array<i64: 1, 128>}, {pipeline_mode = #tpu.pipeline_mode<synchronous>, transform_indices = @transform_10, window_bounds = array<i64: 1, 128>}, {pipeline_mode = #tpu.pipeline_mode<synchronous>, transform_indices = @transform_11, window_bounds = array<i64: 1, 1>}, {transform_indices = @transform_12, window_bounds = array<i64: 1, 2, 1>}]} {
    %c0 = arith.constant 0 : index
    %c0_0 = arith.constant 0 : index
    %0 = vector.load %arg3[%c0, %c0_0] : memref<224x32xbf16, #tpu.memory_space<vmem>>, vector<224x32xbf16>
    %c0_1 = arith.constant 0 : index
    %c0_2 = arith.constant 0 : index
    %c0_3 = arith.constant 0 : index
    %1 = vector.load %arg1[%c0_1, %c0_2, %c0_3] : memref<2x64x224xbf16, #tpu.memory_space<vmem>>, vector<2x64x224xbf16>
    %2 = vector.shape_cast %1 : vector<2x64x224xbf16> to vector<128x224xbf16>
    %cst = arith.constant dense<0.000000e+00> : vector<128x32xf32>
    %3 = tpu.matmul %2, %0, %cst {dimension_numbers = #tpu.dot_dimension_numbers<[1], [0], [0], [1], [0, 0, 1, 1], [], []>} : vector<128x224xbf16>, vector<224x32xbf16>, vector<128x32xf32> -> vector<128x32xf32>
    %c0_4 = arith.constant 0 : index
    %c0_5 = arith.constant 0 : index
    %c0_6 = arith.constant 0 : index
    %4 = vector.load %arg2[%c0_4, %c0_5, %c0_6] : memref<2x64x224xbf16, #tpu.memory_space<vmem>>, vector<2x64x224xbf16>
    %5 = vector.shape_cast %4 : vector<2x64x224xbf16> to vector<128x224xbf16>
    %cst_7 = arith.constant dense<0.000000e+00> : vector<128x32xf32>
    %6 = tpu.matmul %5, %0, %cst_7 {dimension_numbers = #tpu.dot_dimension_numbers<[1], [0], [0], [1], [0, 0, 1, 1], [], []>} : vector<128x224xbf16>, vector<224x32xbf16>, vector<128x32xf32> -> vector<128x32xf32>
    %7 = arith.maximumf %3, %6 : vector<128x32xf32>
    %c0_8 = arith.constant 0 : index
    %c0_9 = arith.constant 0 : index
    %8 = vector.load %arg4[%c0_8, %c0_9] : memref<1x32xf32, #tpu.memory_space<vmem>>, vector<1x32xf32>
    %9 = vector.broadcast %8 : vector<1x32xf32> to vector<128x32xf32>
    %10 = arith.addf %7, %9 : vector<128x32xf32>
    %cst_10 = arith.constant 0.000000e+00 : f32
    %11 = vector.broadcast %cst_10 : f32 to vector<128x32xf32>
    %12 = arith.maximumf %10, %11 : vector<128x32xf32>
    %cst_11 = arith.constant 0.000000e+00 : f32
    %13 = vector.broadcast %cst_11 : f32 to vector<2x2x32xf32>
    %c0_12 = arith.constant 0 : index
    %c0_13 = arith.constant 0 : index
    %c0_14 = arith.constant 0 : index
    %14 = vector.load %arg14[%c0_12, %c0_13, %c0_14] : memref<2x68x32xf32, #tpu.memory_space<vmem>>, vector<2x2x32xf32>
    tpu.vector_store %arg14[%c0_12, %c0_13, %c0_14], %13 {strides = array<i32>} : memref<2x68x32xf32, #tpu.memory_space<vmem>>, vector<2x2x32xf32>,
    %cst_15 = arith.constant 0.000000e+00 : f32
    %15 = vector.broadcast %cst_15 : f32 to vector<2x2x32xf32>
    %c0_16 = arith.constant 0 : index
    %c66 = arith.constant 66 : index
    %c0_17 = arith.constant 0 : index
    %16 = vector.load %arg14[%c0_16, %c66, %c0_17] : memref<2x68x32xf32, #tpu.memory_space<vmem>>, vector<2x2x32xf32>
    tpu.vector_store %arg14[%c0_16, %c66, %c0_17], %15 {strides = array<i32>} : memref<2x68x32xf32, #tpu.memory_space<vmem>>, vector<2x2x32xf32>,
    %17 = vector.shape_cast %12 : vector<128x32xf32> to vector<2x64x32xf32>
    %c0_18 = arith.constant 0 : index
    %c2 = arith.constant 2 : index
    %c0_19 = arith.constant 0 : index
    %18 = vector.load %arg14[%c0_18, %c2, %c0_19] : memref<2x68x32xf32, #tpu.memory_space<vmem>>, vector<2x64x32xf32>
    tpu.vector_store %arg14[%c0_18, %c2, %c0_19], %17 {strides = array<i32>} : memref<2x68x32xf32, #tpu.memory_space<vmem>>, vector<2x64x32xf32>,
    %c0_20 = arith.constant 0 : index
    %c0_21 = arith.constant 0 : index
    %19 = vector.load %arg5[%c0_20, %c0_21] : memref<160x64xbf16, #tpu.memory_space<vmem>>, vector<160x64xbf16>
    %c0_22 = arith.constant 0 : index
    %c0_23 = arith.constant 0 : index
    %c0_24 = arith.constant 0 : index
    %20 = tpu.strided_load %arg14[%c0_22, %c0_23, %c0_24] {strides = array<i32: 1, 2, 1>} : memref<2x68x32xf32, #tpu.memory_space<vmem>>, vector<2x32x32xf32>
    %c0_25 = arith.constant 0 : index
    %c1 = arith.constant 1 : index
    %c0_26 = arith.constant 0 : index
    %21 = tpu.strided_load %arg14[%c0_25, %c1, %c0_26] {strides = array<i32: 1, 2, 1>} : memref<2x68x32xf32, #tpu.memory_space<vmem>>, vector<2x32x32xf32>
    %c0_27 = arith.constant 0 : index
    %c2_28 = arith.constant 2 : index
    %c0_29 = arith.constant 0 : index
    %22 = tpu.strided_load %arg14[%c0_27, %c2_28, %c0_29] {strides = array<i32: 1, 2, 1>} : memref<2x68x32xf32, #tpu.memory_space<vmem>>, vector<2x32x32xf32>
    %c0_30 = arith.constant 0 : index
    %c3 = arith.constant 3 : index
    %c0_31 = arith.constant 0 : index
    %23 = tpu.strided_load %arg14[%c0_30, %c3, %c0_31] {strides = array<i32: 1, 2, 1>} : memref<2x68x32xf32, #tpu.memory_space<vmem>>, vector<2x32x32xf32>
    %c0_32 = arith.constant 0 : index
    %c4 = arith.constant 4 : index
    %c0_33 = arith.constant 0 : index
    %24 = tpu.strided_load %arg14[%c0_32, %c4, %c0_33] {strides = array<i32: 1, 2, 1>} : memref<2x68x32xf32, #tpu.memory_space<vmem>>, vector<2x32x32xf32>
    %25 = tpu.concatenate %20, %21, %22, %23, %24 in 2 : vector<2x32x32xf32>, vector<2x32x32xf32>, vector<2x32x32xf32>, vector<2x32x32xf32>, vector<2x32x32xf32> -> vector<2x32x160xf32>
    %26 = vector.shape_cast %25 : vector<2x32x160xf32> to vector<64x160xf32>
    %27 = arith.truncf %26 : vector<64x160xf32> to vector<64x160xbf16>
    %cst_34 = arith.constant dense<0.000000e+00> : vector<64x64xf32>
    %28 = tpu.matmul %27, %19, %cst_34 {dimension_numbers = #tpu.dot_dimension_numbers<[1], [0], [0], [1], [0, 0, 1, 1], [], []>} : vector<64x160xbf16>, vector<160x64xbf16>, vector<64x64xf32> -> vector<64x64xf32>
    %c0_35 = arith.constant 0 : index
    %c1_36 = arith.constant 1 : index
    %c0_37 = arith.constant 0 : index
    %29 = tpu.strided_load %arg14[%c0_35, %c1_36, %c0_37] {strides = array<i32: 1, 2, 1>} : memref<2x68x32xf32, #tpu.memory_space<vmem>>, vector<2x32x32xf32>
    %c0_38 = arith.constant 0 : index
    %c2_39 = arith.constant 2 : index
    %c0_40 = arith.constant 0 : index
    %30 = tpu.strided_load %arg14[%c0_38, %c2_39, %c0_40] {strides = array<i32: 1, 2, 1>} : memref<2x68x32xf32, #tpu.memory_space<vmem>>, vector<2x32x32xf32>
    %c0_41 = arith.constant 0 : index
    %c3_42 = arith.constant 3 : index
    %c0_43 = arith.constant 0 : index
    %31 = tpu.strided_load %arg14[%c0_41, %c3_42, %c0_43] {strides = array<i32: 1, 2, 1>} : memref<2x68x32xf32, #tpu.memory_space<vmem>>, vector<2x32x32xf32>
    %c0_44 = arith.constant 0 : index
    %c4_45 = arith.constant 4 : index
    %c0_46 = arith.constant 0 : index
    %32 = tpu.strided_load %arg14[%c0_44, %c4_45, %c0_46] {strides = array<i32: 1, 2, 1>} : memref<2x68x32xf32, #tpu.memory_space<vmem>>, vector<2x32x32xf32>
    %c0_47 = arith.constant 0 : index
    %c5 = arith.constant 5 : index
    %c0_48 = arith.constant 0 : index
    %33 = tpu.strided_load %arg14[%c0_47, %c5, %c0_48] {strides = array<i32: 1, 2, 1>} : memref<2x68x32xf32, #tpu.memory_space<vmem>>, vector<2x32x32xf32>
    %34 = tpu.concatenate %29, %30, %31, %32, %33 in 2 : vector<2x32x32xf32>, vector<2x32x32xf32>, vector<2x32x32xf32>, vector<2x32x32xf32>, vector<2x32x32xf32> -> vector<2x32x160xf32>
    %35 = vector.shape_cast %34 : vector<2x32x160xf32> to vector<64x160xf32>
    %36 = arith.truncf %35 : vector<64x160xf32> to vector<64x160xbf16>
    %cst_49 = arith.constant dense<0.000000e+00> : vector<64x64xf32>
    %37 = tpu.matmul %36, %19, %cst_49 {dimension_numbers = #tpu.dot_dimension_numbers<[1], [0], [0], [1], [0, 0, 1, 1], [], []>} : vector<64x160xbf16>, vector<160x64xbf16>, vector<64x64xf32> -> vector<64x64xf32>
    %38 = arith.maximumf %28, %37 : vector<64x64xf32>
    %c0_50 = arith.constant 0 : index
    %c0_51 = arith.constant 0 : index
    %39 = vector.load %arg6[%c0_50, %c0_51] : memref<1x64xf32, #tpu.memory_space<vmem>>, vector<1x64xf32>
    %40 = vector.broadcast %39 : vector<1x64xf32> to vector<64x64xf32>
    %41 = arith.addf %38, %40 : vector<64x64xf32>
    %cst_52 = arith.constant 0.000000e+00 : f32
    %42 = vector.broadcast %cst_52 : f32 to vector<64x64xf32>
    %43 = arith.maximumf %41, %42 : vector<64x64xf32>
    %cst_53 = arith.constant 0.000000e+00 : f32
    %44 = vector.broadcast %cst_53 : f32 to vector<2x1x64xf32>
    %c0_54 = arith.constant 0 : index
    %c0_55 = arith.constant 0 : index
    %c0_56 = arith.constant 0 : index
    %45 = vector.load %arg15[%c0_54, %c0_55, %c0_56] : memref<2x34x64xf32, #tpu.memory_space<vmem>>, vector<2x1x64xf32>
    tpu.vector_store %arg15[%c0_54, %c0_55, %c0_56], %44 {strides = array<i32>} : memref<2x34x64xf32, #tpu.memory_space<vmem>>, vector<2x1x64xf32>,
    %cst_57 = arith.constant 0.000000e+00 : f32
    %46 = vector.broadcast %cst_57 : f32 to vector<2x1x64xf32>
    %c0_58 = arith.constant 0 : index
    %c33 = arith.constant 33 : index
    %c0_59 = arith.constant 0 : index
    %47 = vector.load %arg15[%c0_58, %c33, %c0_59] : memref<2x34x64xf32, #tpu.memory_space<vmem>>, vector<2x1x64xf32>
    tpu.vector_store %arg15[%c0_58, %c33, %c0_59], %46 {strides = array<i32>} : memref<2x34x64xf32, #tpu.memory_space<vmem>>, vector<2x1x64xf32>,
    %48 = vector.shape_cast %43 : vector<64x64xf32> to vector<2x32x64xf32>
    %c0_60 = arith.constant 0 : index
    %c1_61 = arith.constant 1 : index
    %c0_62 = arith.constant 0 : index
    %49 = vector.load %arg15[%c0_60, %c1_61, %c0_62] : memref<2x34x64xf32, #tpu.memory_space<vmem>>, vector<2x32x64xf32>
    tpu.vector_store %arg15[%c0_60, %c1_61, %c0_62], %48 {strides = array<i32>} : memref<2x34x64xf32, #tpu.memory_space<vmem>>, vector<2x32x64xf32>,
    %c0_63 = arith.constant 0 : index
    %c0_64 = arith.constant 0 : index
    %50 = vector.load %arg7[%c0_63, %c0_64] : memref<192x128xbf16, #tpu.memory_space<vmem>>, vector<192x128xbf16>
    %c0_65 = arith.constant 0 : index
    %c0_66 = arith.constant 0 : index
    %c0_67 = arith.constant 0 : index
    %51 = tpu.strided_load %arg15[%c0_65, %c0_66, %c0_67] {strides = array<i32: 1, 2, 1>} : memref<2x34x64xf32, #tpu.memory_space<vmem>>, vector<2x16x64xf32>
    %c0_68 = arith.constant 0 : index
    %c1_69 = arith.constant 1 : index
    %c0_70 = arith.constant 0 : index
    %52 = tpu.strided_load %arg15[%c0_68, %c1_69, %c0_70] {strides = array<i32: 1, 2, 1>} : memref<2x34x64xf32, #tpu.memory_space<vmem>>, vector<2x16x64xf32>
    %c0_71 = arith.constant 0 : index
    %c2_72 = arith.constant 2 : index
    %c0_73 = arith.constant 0 : index
    %53 = tpu.strided_load %arg15[%c0_71, %c2_72, %c0_73] {strides = array<i32: 1, 2, 1>} : memref<2x34x64xf32, #tpu.memory_space<vmem>>, vector<2x16x64xf32>
    %54 = tpu.concatenate %51, %52, %53 in 2 : vector<2x16x64xf32>, vector<2x16x64xf32>, vector<2x16x64xf32> -> vector<2x16x192xf32>
    %55 = vector.shape_cast %54 : vector<2x16x192xf32> to vector<32x192xf32>
    %56 = arith.truncf %55 : vector<32x192xf32> to vector<32x192xbf16>
    %cst_74 = arith.constant dense<0.000000e+00> : vector<32x128xf32>
    %57 = tpu.matmul %56, %50, %cst_74 {dimension_numbers = #tpu.dot_dimension_numbers<[1], [0], [0], [1], [0, 0, 1, 1], [], []>} : vector<32x192xbf16>, vector<192x128xbf16>, vector<32x128xf32> -> vector<32x128xf32>
    %c0_75 = arith.constant 0 : index
    %c1_76 = arith.constant 1 : index
    %c0_77 = arith.constant 0 : index
    %58 = tpu.strided_load %arg15[%c0_75, %c1_76, %c0_77] {strides = array<i32: 1, 2, 1>} : memref<2x34x64xf32, #tpu.memory_space<vmem>>, vector<2x16x64xf32>
    %c0_78 = arith.constant 0 : index
    %c2_79 = arith.constant 2 : index
    %c0_80 = arith.constant 0 : index
    %59 = tpu.strided_load %arg15[%c0_78, %c2_79, %c0_80] {strides = array<i32: 1, 2, 1>} : memref<2x34x64xf32, #tpu.memory_space<vmem>>, vector<2x16x64xf32>
    %c0_81 = arith.constant 0 : index
    %c3_82 = arith.constant 3 : index
    %c0_83 = arith.constant 0 : index
    %60 = tpu.strided_load %arg15[%c0_81, %c3_82, %c0_83] {strides = array<i32: 1, 2, 1>} : memref<2x34x64xf32, #tpu.memory_space<vmem>>, vector<2x16x64xf32>
    %61 = tpu.concatenate %58, %59, %60 in 2 : vector<2x16x64xf32>, vector<2x16x64xf32>, vector<2x16x64xf32> -> vector<2x16x192xf32>
    %62 = vector.shape_cast %61 : vector<2x16x192xf32> to vector<32x192xf32>
    %63 = arith.truncf %62 : vector<32x192xf32> to vector<32x192xbf16>
    %cst_84 = arith.constant dense<0.000000e+00> : vector<32x128xf32>
    %64 = tpu.matmul %63, %50, %cst_84 {dimension_numbers = #tpu.dot_dimension_numbers<[1], [0], [0], [1], [0, 0, 1, 1], [], []>} : vector<32x192xbf16>, vector<192x128xbf16>, vector<32x128xf32> -> vector<32x128xf32>
    %65 = arith.maximumf %57, %64 : vector<32x128xf32>
    %c0_85 = arith.constant 0 : index
    %c0_86 = arith.constant 0 : index
    %66 = vector.load %arg8[%c0_85, %c0_86] : memref<1x128xf32, #tpu.memory_space<vmem>>, vector<1x128xf32>
    %67 = vector.broadcast %66 : vector<1x128xf32> to vector<32x128xf32>
    %68 = arith.addf %65, %67 : vector<32x128xf32>
    %cst_87 = arith.constant 0.000000e+00 : f32
    %69 = vector.broadcast %cst_87 : f32 to vector<32x128xf32>
    %70 = arith.maximumf %68, %69 : vector<32x128xf32>
    %71 = vector.shape_cast %70 : vector<32x128xf32> to vector<2x16x128xf32>
    %cst_88 = arith.constant dense<0.000000e+00> : vector<2x128xf32>
    %72 = vector.multi_reduction <add>, %71, %cst_88 [1] : vector<2x16x128xf32> to vector<2x128xf32>
    %cst_89 = arith.constant 6.250000e-02 : f32
    %73 = vector.broadcast %cst_89 : f32 to vector<2x128xf32>
    %74 = arith.mulf %72, %73 : vector<2x128xf32>
    %75 = arith.truncf %74 : vector<2x128xf32> to vector<2x128xbf16>
    %c0_90 = arith.constant 0 : index
    %c0_91 = arith.constant 0 : index
    %76 = vector.load %arg9[%c0_90, %c0_91] : memref<128x128xbf16, #tpu.memory_space<vmem>>, vector<128x128xbf16>
    %cst_92 = arith.constant dense<0.000000e+00> : vector<2x128xf32>
    %77 = tpu.matmul %75, %76, %cst_92 {dimension_numbers = #tpu.dot_dimension_numbers<[1], [0], [0], [1], [0, 0, 1, 1], [], []>} : vector<2x128xbf16>, vector<128x128xbf16>, vector<2x128xf32> -> vector<2x128xf32>
    %c0_93 = arith.constant 0 : index
    %c0_94 = arith.constant 0 : index
    %78 = vector.load %arg10[%c0_93, %c0_94] : memref<1x128xf32, #tpu.memory_space<vmem>>, vector<1x128xf32>
    %79 = vector.broadcast %78 : vector<1x128xf32> to vector<2x128xf32>
    %80 = arith.addf %77, %79 : vector<2x128xf32>
    %cst_95 = arith.constant 0.000000e+00 : f32
    %81 = vector.broadcast %cst_95 : f32 to vector<2x128xf32>
    %82 = arith.maximumf %80, %81 : vector<2x128xf32>
    %c0_96 = arith.constant 0 : index
    %c0_97 = arith.constant 0 : index
    %83 = vector.load %arg11[%c0_96, %c0_97] : memref<1x128xf32, #tpu.memory_space<vmem>>, vector<1x128xf32>
    %84 = vector.broadcast %83 : vector<1x128xf32> to vector<2x128xf32>
    %85 = arith.mulf %82, %84 : vector<2x128xf32>
    %cst_98 = arith.constant dense<0.000000e+00> : vector<2xf32>
    %86 = vector.multi_reduction <add>, %85, %cst_98 [1] : vector<2x128xf32> to vector<2xf32>
    %87 = vector.shape_cast %86 : vector<2xf32> to vector<2x1xf32>
    %c0_99 = arith.constant 0 : index
    %c0_100 = arith.constant 0 : index
    %88 = vector.load %arg12[%c0_99, %c0_100] : memref<1x1xf32, #tpu.memory_space<vmem>>, vector<1x1xf32>
    %89 = vector.broadcast %88 : vector<1x1xf32> to vector<2x1xf32>
    %90 = arith.addf %87, %89 : vector<2x1xf32>
    %c0_101 = arith.constant 0 : index
    %c0_102 = arith.constant 0 : index
    %c0_103 = arith.constant 0 : index
    %91 = vector.load %arg13[%c0_101, %c0_102, %c0_103] : memref<1x2x1xf32, #tpu.memory_space<vmem>>, vector<1x2x1xf32>
    %92 = vector.shape_cast %91 : vector<1x2x1xf32> to vector<2x1xf32>
    %93 = vector.shape_cast %90 : vector<2x1xf32> to vector<1x2x1xf32>
    tpu.vector_store %arg13[%c0_101, %c0_102, %c0_103], %93 {strides = array<i32>} : memref<1x2x1xf32, #tpu.memory_space<vmem>>, vector<1x2x1xf32>,
    return
  }
  func.func @transform_0(%arg0: i32) -> (i32, i32, i32) {
    %c0_i32 = arith.constant 0 : i32
    %c0_i32_0 = arith.constant 0 : i32
    %c0_i32_1 = arith.constant 0 : i32
    return %arg0, %c0_i32, %c0_i32_0 : i32, i32, i32
  }
  func.func @transform_1(%arg0: i32) -> (i32, i32, i32) {
    %c0_i32 = arith.constant 0 : i32
    %c0_i32_0 = arith.constant 0 : i32
    %c0_i32_1 = arith.constant 0 : i32
    return %arg0, %c0_i32, %c0_i32_0 : i32, i32, i32
  }
  func.func @transform_2(%arg0: i32) -> (i32, i32) {
    %c0_i32 = arith.constant 0 : i32
    %c0_i32_0 = arith.constant 0 : i32
    %c0_i32_1 = arith.constant 0 : i32
    return %c0_i32, %c0_i32_0 : i32, i32
  }
  func.func @transform_3(%arg0: i32) -> (i32, i32) {
    %c0_i32 = arith.constant 0 : i32
    %c0_i32_0 = arith.constant 0 : i32
    %c0_i32_1 = arith.constant 0 : i32
    return %c0_i32, %c0_i32_0 : i32, i32
  }
  func.func @transform_4(%arg0: i32) -> (i32, i32) {
    %c0_i32 = arith.constant 0 : i32
    %c0_i32_0 = arith.constant 0 : i32
    %c0_i32_1 = arith.constant 0 : i32
    return %c0_i32, %c0_i32_0 : i32, i32
  }
  func.func @transform_5(%arg0: i32) -> (i32, i32) {
    %c0_i32 = arith.constant 0 : i32
    %c0_i32_0 = arith.constant 0 : i32
    %c0_i32_1 = arith.constant 0 : i32
    return %c0_i32, %c0_i32_0 : i32, i32
  }
  func.func @transform_6(%arg0: i32) -> (i32, i32) {
    %c0_i32 = arith.constant 0 : i32
    %c0_i32_0 = arith.constant 0 : i32
    %c0_i32_1 = arith.constant 0 : i32
    return %c0_i32, %c0_i32_0 : i32, i32
  }
  func.func @transform_7(%arg0: i32) -> (i32, i32) {
    %c0_i32 = arith.constant 0 : i32
    %c0_i32_0 = arith.constant 0 : i32
    %c0_i32_1 = arith.constant 0 : i32
    return %c0_i32, %c0_i32_0 : i32, i32
  }
  func.func @transform_8(%arg0: i32) -> (i32, i32) {
    %c0_i32 = arith.constant 0 : i32
    %c0_i32_0 = arith.constant 0 : i32
    %c0_i32_1 = arith.constant 0 : i32
    return %c0_i32, %c0_i32_0 : i32, i32
  }
  func.func @transform_9(%arg0: i32) -> (i32, i32) {
    %c0_i32 = arith.constant 0 : i32
    %c0_i32_0 = arith.constant 0 : i32
    %c0_i32_1 = arith.constant 0 : i32
    return %c0_i32, %c0_i32_0 : i32, i32
  }
  func.func @transform_10(%arg0: i32) -> (i32, i32) {
    %c0_i32 = arith.constant 0 : i32
    %c0_i32_0 = arith.constant 0 : i32
    %c0_i32_1 = arith.constant 0 : i32
    return %c0_i32, %c0_i32_0 : i32, i32
  }
  func.func @transform_11(%arg0: i32) -> (i32, i32) {
    %c0_i32 = arith.constant 0 : i32
    %c0_i32_0 = arith.constant 0 : i32
    %c0_i32_1 = arith.constant 0 : i32
    return %c0_i32, %c0_i32_0 : i32, i32
  }
  func.func @transform_12(%arg0: i32) -> (i32, i32, i32) {
    %c0_i32 = arith.constant 0 : i32
    %c0_i32_0 = arith.constant 0 : i32
    %c0_i32_1 = arith.constant 0 : i32
    return %arg0, %c0_i32, %c0_i32_0 : i32, i32, i32
  }
}

</mosaic_0001>

<bundles_post_ra>
// kernel: _lambda_.1
= control target key start
LH: loop header
LB: loop body
LE: loop exit
PB: predicated region body
PF: predicated region fallthrough
CT: control target
= control target key end

     0   :  { %v2111_v0 = vmov 0   ;;  %vm244_vm0 = vcmask 785408   ;;  %vm630_vm1 = vcmask 254976   ;;  %v2112_v47 = vmov 0.0   ;;  %s2114_s20 = smov 32   ;;  %s2115_s21 = smov 96   ;;  %s2749_s2 = inlined_call_operand.vmem [shape: bf16[224,32], index: 2, kind: input, shape index: {}]   ;;  %s2750_s0 = inlined_call_operand.vmem [shape: bf16[2,64,224], index: 0, kind: input, shape index: {}]   ;;  %s2751_s1 = inlined_call_operand.vmem [shape: bf16[2,64,224], index: 1, kind: input, shape index: {}]   ;;  %s2752_s4 = inlined_call_operand.vmem [shape: bf16[160,64], index: 4, kind: input, shape index: {}]   ;;  %s2753_s3 = inlined_call_operand.vmem [shape: f32[1,32], index: 3, kind: input, shape index: {}]   ;;  %s2754_s6 = inlined_call_operand.vmem [shape: bf16[192,128], index: 6, kind: input, shape index: {}]   ;;  %s2755_s5 = inlined_call_operand.vmem [shape: f32[1,64], index: 5, kind: input, shape index: {}]   ;;  %s2756_s8 = inlined_call_operand.vmem [shape: bf16[128,128], index: 8, kind: input, shape index: {}]   ;;  %s2757_s7 = inlined_call_operand.vmem [shape: f32[1,128], index: 7, kind: input, shape index: {}]   ;;  %s2758_s11 = inlined_call_operand.<no memory space> [shape: f32[1,1], index: 11, kind: input, shape index: {}]   ;;  %s2759_s9 = inlined_call_operand.vmem [shape: f32[1,128], index: 9, kind: input, shape index: {}]   ;;  %s2760_s10 = inlined_call_operand.vmem [shape: f32[1,128], index: 10, kind: input, shape index: {}]   ;;  %s2761_s12 = inlined_call_operand.vmem [shape: f32[1,2,1], index: 12, kind: output, shape index: {}]  }
   0x1   :  { %269 = vmatprep.subr.bf16.mxu0 %v2111_v0  ;;  %478 = vmatprep.subr.bf16.mxu1 %v2111_v0  ;;  %v2019_v1 = vld [vmem:[%s2749_s2] sm:$0xff]   ;;  %v2020_v2 = vld [vmem:[%s2749_s2 + $0x8] sm:$0xff]   ;;  %v2021_v3 = vld [vmem:[%s2749_s2 + $0x10] sm:$0xff]   ;;  %631 = vst.msk [vmem:[#allocation2] sm:$0x3] %vm630_vm1, %v2112_v47  ;;  %vm635_vm2 = vcmask 261120  }
   0x2   :  { %270 = vmatpush1.bf16.msra.mxu0 %v2019_v1  ;;  %479 = vmatpush1.bf16.msra.mxu1 %v2019_v1  ;;  %v2022_v4 = vld [vmem:[%s2749_s2 + $0x18] sm:$0xff]   ;;  %v2023_v5 = vld [vmem:[%s2749_s2 + $0x20] sm:$0xff]   ;;  %v2024_v8 = vld [vmem:[%s2749_s2 + $0x28] sm:$0xff]   ;;  %632 = vst.msk [vmem:[#allocation2 + $0x48] sm:$0x3] %vm630_vm1, %v2112_v47  ;;  %vm855_vm3 = vcmask 523264  }
   0x3   :  { %271 = vmatprep.subr.bf16.mxu0 %v2111_v0  ;;  %480 = vmatprep.subr.bf16.mxu1 %v2111_v0  ;;  %v2035_v6 = vld [vmem:[%s2750_s0 + $0x4] ss:$8 sps:$4 sm:$0xff]   ;;  %v2025_v9 = vld [vmem:[%s2749_s2 + $0x30] sm:$0xff]   ;;  %v2026_v10 = vld [vmem:[%s2749_s2 + $0x38] sm:$0xff]   ;;  %633 = vst.msk [vmem:[#allocation2 + $0x42] sm:$0x3] %vm630_vm1, %v2112_v47 }
   0x4   :  { %v2038_v7 = vld [vmem:[%s2751_s1 + $0x4] ss:$8 sps:$4 sm:$0xff]   ;;  %1764 = vmatprep.mubr.msk.bf16.mxu0 %vm244_vm0, %v2035_v6  ;;  %v2029_v13 = vld [vmem:[%s2749_s2 + $0x50] sm:$0xff]   ;;  %v2030_v14 = vld [vmem:[%s2749_s2 + $0x58] sm:$0xff]   ;;  %634 = vst.msk [vmem:[#allocation2 + $0x8a] sm:$0x3] %vm630_vm1, %v2112_v47 }
   0x5   :  { %1788 = vmatprep.mubr.msk.bf16.mxu1 %vm244_vm0, %v2038_v7  ;;  %v2027_v11 = vld [vmem:[%s2749_s2 + $0x40] sm:$0xff]   ;;  %v2028_v12 = vld [vmem:[%s2749_s2 + $0x48] sm:$0xff]   ;;  %v2039_v19 = vld [vmem:[%s2750_s0 + $0x14] ss:$8 sps:$4 sm:$0xff]   ;;  %vm1253_vm4 = vcmask 516096   ;;  %vm2116_vm5 = vmmov 0  }
   0x6   :  { %272 = vmatpush1.bf16.msra.mxu0 %v2020_v2  ;;  %481 = vmatpush1.bf16.msra.mxu1 %v2020_v2  ;;  %v2031_v15 = vld [vmem:[%s2749_s2 + $0x60] sm:$0xff]   ;;  %v2032_v16 = vld [vmem:[%s2749_s2 + $0x68] sm:$0xff]   ;;  %v2041_v20 = vld [vmem:[%s2751_s1 + $0x14] ss:$8 sps:$4 sm:$0xff]   ;;  %1256 = vst.msk [vmem:[#allocation3 + $0x21] sm:$0x1] %vm1253_vm4, %v2112_v47 }
   0x7   :  { %273 = vmatprep.subr.bf16.mxu0 %v2111_v0  ;;  %482 = vmatprep.subr.bf16.mxu1 %v2111_v0  ;;  %v2033_v17 = vld [vmem:[%s2750_s0] ss:$8 sps:$4 sm:$0xff]   ;;  %v2043_v21 = vld [vmem:[%s2750_s0 + $0x10] ss:$8 sps:$4 sm:$0xff]   ;;  %v2045_v23 = vld [vmem:[%s2750_s0 + $0x24] ss:$8 sps:$4 sm:$0xff]  }
   0x8   :  { %v2036_v18 = vld [vmem:[%s2751_s1] ss:$8 sps:$4 sm:$0xff]   ;;  %v2044_v22 = vld [vmem:[%s2751_s1 + $0x10] ss:$8 sps:$4 sm:$0xff]   ;;  %v2047_v24 = vld [vmem:[%s2751_s1 + $0x24] ss:$8 sps:$4 sm:$0xff]  }
   0x9   :  { %v2049_v25 = vld [vmem:[%s2750_s0 + $0x20] ss:$8 sps:$4 sm:$0xff]   ;;  %v2051_v27 = vld [vmem:[%s2750_s0 + $0x34] ss:$8 sps:$4 sm:$0xff]   ;;  %v2055_v29 = vld [vmem:[%s2750_s0 + $0x30] ss:$8 sps:$4 sm:$0xff]  }
   0xa   :  { %274 = vmatpush1.bf16.msra.mxu0 %v2021_v3  ;;  %483 = vmatpush1.bf16.msra.mxu1 %v2021_v3  ;;  %v2050_v26 = vld [vmem:[%s2751_s1 + $0x20] ss:$8 sps:$4 sm:$0xff]   ;;  %v2053_v28 = vld [vmem:[%s2751_s1 + $0x34] ss:$8 sps:$4 sm:$0xff]   ;;  %v2056_v30 = vld [vmem:[%s2751_s1 + $0x30] ss:$8 sps:$4 sm:$0xff]  }
   0xb   :  { %275 = vmatprep.subr.bf16.mxu0 %v2111_v0  ;;  %484 = vmatprep.subr.bf16.mxu1 %v2111_v0  ;;  %v2057_v31 = vld [vmem:[%s2750_s0 + $0x44] ss:$8 sps:$4 sm:$0xff]   ;;  %v2061_v33 = vld [vmem:[%s2750_s0 + $0x40] ss:$8 sps:$4 sm:$0xff]   ;;  %v2063_v35 = vld [vmem:[%s2750_s0 + $0x54] ss:$8 sps:$4 sm:$0xff]  }
   0xc   :  { %v2059_v32 = vld [vmem:[%s2751_s1 + $0x44] ss:$8 sps:$4 sm:$0xff]   ;;  %v2062_v34 = vld [vmem:[%s2751_s1 + $0x40] ss:$8 sps:$4 sm:$0xff]   ;;  %v2065_v36 = vld [vmem:[%s2751_s1 + $0x54] ss:$8 sps:$4 sm:$0xff]  }
   0xd   :  { %v2067_v37 = vld [vmem:[%s2750_s0 + $0x50] ss:$8 sps:$4 sm:$0xff]   ;;  %v2069_v39 = vld [vmem:[%s2750_s0 + $0x64] ss:$8 sps:$4 sm:$0xff]   ;;  %v2073_v41 = vld [vmem:[%s2750_s0 + $0x60] ss:$8 sps:$4 sm:$0xff]  }
   0xe   :  { %276 = vmatpush1.bf16.msra.mxu0 %v2022_v4  ;;  %485 = vmatpush1.bf16.msra.mxu1 %v2022_v4  ;;  %v2068_v38 = vld [vmem:[%s2751_s1 + $0x50] ss:$8 sps:$4 sm:$0xff]   ;;  %v2071_v40 = vld [vmem:[%s2751_s1 + $0x64] ss:$8 sps:$4 sm:$0xff]   ;;  %v2074_v42 = vld [vmem:[%s2751_s1 + $0x60] ss:$8 sps:$4 sm:$0xff]  }
   0xf   :  { %277 = vmatprep.subr.bf16.mxu0 %v2111_v0  ;;  %486 = vmatprep.subr.bf16.mxu1 %v2111_v0  ;;  %v2075_v43 = vld [vmem:[%s2750_s0 + $0x74] ss:$8 sps:$4 sm:$0xff]   ;;  %v2079_v45 = vld [vmem:[%s2750_s0 + $0x70] ss:$8 sps:$4 sm:$0xff]   ;;  %v2081_v48 = vld [vmem:[%s2752_s4] sm:$0xff]   ;;  %vm1615_vm6 = vcmask 1041409  }
  0x10   :  { %v2077_v44 = vld [vmem:[%s2751_s1 + $0x74] ss:$8 sps:$4 sm:$0xff]   ;;  %v2080_v46 = vld [vmem:[%s2751_s1 + $0x70] ss:$8 sps:$4 sm:$0xff]   ;;  %v2082_v49 = vld [vmem:[%s2752_s4 + $0x8] sm:$0xff]   ;;  %vm1716_vm7 = vcmask 1041408  }
  0x11   :  { %v2083_v50 = vld [vmem:[%s2752_s4 + $0x10] sm:$0xff]   ;;  %v2084_v51 = vld [vmem:[%s2752_s4 + $0x18] sm:$0xff]   ;;  %v2085_v52 = vld [vmem:[%s2752_s4 + $0x20] sm:$0xff]   ;;  %1254 = vst.msk [vmem:[#allocation3] sm:$0x1] %vm1253_vm4, %v2112_v47  ;;  %vm1728_vm8 = vcmask 1024  }
  0x12   :  { %278 = vmatpush1.bf16.msra.mxu0 %v2023_v5  ;;  %487 = vmatpush1.bf16.msra.mxu1 %v2023_v5  ;;  %v2086_v53 = vld [vmem:[%s2752_s4 + $0x28] sm:$0xff]   ;;  %v2087_v54 = vld [vmem:[%s2752_s4 + $0x30] sm:$0xff]   ;;  %v2408_v57 = vld [vmem:[%s2753_s3] ss:$0 sm:$0xff]  ;;  %1255 = vst.msk [vmem:[#allocation3 + $0x28] sm:$0x1] %vm1253_vm4, %v2112_v47 }
  0x13   :  { %279 = vmatprep.subr.bf16.mxu0 %v2111_v0  ;;  %488 = vmatprep.subr.bf16.mxu1 %v2111_v0  ;;  %1257 = vst.msk [vmem:[#allocation3 + $0x49] sm:$0x1] %vm1253_vm4, %v2112_v47 }
  0x16   :  { %280 = vmatpush1.bf16.msra.mxu0 %v2024_v8  ;;  %489 = vmatpush1.bf16.msra.mxu1 %v2024_v8 }
  0x17   :  { %281 = vmatprep.subr.bf16.mxu0 %v2111_v0  ;;  %490 = vmatprep.subr.bf16.mxu1 %v2111_v0 }
  0x1a   :  { %282 = vmatpush1.bf16.msra.mxu0 %v2025_v9  ;;  %491 = vmatpush1.bf16.msra.mxu1 %v2025_v9 }
  0x1b   :  { %283 = vmatprep.subr.bf16.mxu0 %v2111_v0  ;;  %492 = vmatprep.subr.bf16.mxu1 %v2111_v0 }
  0x1e   :  { %284 = vmatpush1.bf16.msra.mxu0 %v2026_v10  ;;  %493 = vmatpush1.bf16.msra.mxu1 %v2026_v10 }
  0x1f   :  { %285 = vmatprep.subr.bf16.mxu0 %v2111_v0  ;;  %494 = vmatprep.subr.bf16.mxu1 %v2111_v0 }
  0x22   :  { %286 = vmatpush1.bf16.msra.mxu0 %v2027_v11  ;;  %495 = vmatpush1.bf16.msra.mxu1 %v2027_v11 }
  0x23   :  { %287 = vmatprep.subr.bf16.mxu0 %v2111_v0  ;;  %496 = vmatprep.subr.bf16.mxu1 %v2111_v0 }
  0x26   :  { %288 = vmatpush1.bf16.msra.mxu0 %v2028_v12  ;;  %497 = vmatpush1.bf16.msra.mxu1 %v2028_v12 }
  0x27   :  { %289 = vmatprep.subr.bf16.mxu0 %v2111_v0  ;;  %498 = vmatprep.subr.bf16.mxu1 %v2111_v0 }
  0x2a   :  { %290 = vmatpush1.bf16.msra.mxu0 %v2029_v13  ;;  %499 = vmatpush1.bf16.msra.mxu1 %v2029_v13 }
  0x2b   :  { %291 = vmatprep.subr.bf16.mxu0 %v2111_v0  ;;  %500 = vmatprep.subr.bf16.mxu1 %v2111_v0 }
  0x2e   :  { %292 = vmatpush1.bf16.msra.mxu0 %v2030_v14  ;;  %501 = vmatpush1.bf16.msra.mxu1 %v2030_v14 }
  0x2f   :  { %293 = vmatprep.subr.bf16.mxu0 %v2111_v0  ;;  %502 = vmatprep.subr.bf16.mxu1 %v2111_v0 }
  0x32   :  { %294 = vmatpush1.bf16.msra.mxu0 %v2031_v15  ;;  %503 = vmatpush1.bf16.msra.mxu1 %v2031_v15 }
  0x33   :  { %295 = vmatprep.subr.bf16.mxu0 %v2111_v0  ;;  %504 = vmatprep.subr.bf16.mxu1 %v2111_v0 }
  0x36   :  { %296 = vmatpush1.bf16.msra.mxu0 %v2032_v16  ;;  %505 = vmatpush1.bf16.msra.mxu1 %v2032_v16 }
  0x37   :  { %952 = vmatprep.subr.bf16.mxu0 %v2111_v0  ;;  %1157 = vmatprep.subr.bf16.mxu1 %v2111_v0 }
  0x39   :  { %302 = vmatmul.mubr.bf16.vlgmr.msra.gmra.mrb[0].mxu0 %v2033_v17  ;;  %511 = vmatmul.mubr.bf16.vlgmr.msra.gmra.mrb[0].mxu1 %v2036_v18 }
  0x3a   :  { %1765 = vmatprep.mubr.msk.bf16.mxu0 %vm244_vm0, %v2039_v19  ;;  %1789 = vmatprep.mubr.msk.bf16.mxu1 %vm244_vm0, %v2041_v20 }
  0x3b   :  { %953 = vmatpush1.bf16.msra.mxu0 %v2081_v48  ;;  %1158 = vmatpush1.bf16.msra.mxu1 %v2081_v48 }
  0x3c   :  { %954 = vmatprep.subr.bf16.mxu0 %v2111_v0  ;;  %1159 = vmatprep.subr.bf16.mxu1 %v2111_v0 }
  0x3f   :  { %955 = vmatpush1.bf16.msra.mxu0 %v2082_v49  ;;  %1160 = vmatpush1.bf16.msra.mxu1 %v2082_v49 }
  0x40   :  { %956 = vmatprep.subr.bf16.mxu0 %v2111_v0  ;;  %1161 = vmatprep.subr.bf16.mxu1 %v2111_v0 }
  0x41   :  { %310 = vmatmul.mubr.bf16.gmra.mrb[4].mxu0 %v2043_v21  ;;  %519 = vmatmul.mubr.bf16.gmra.mrb[4].mxu1 %v2044_v22  ;;  %v2088_v21 = vld [vmem:[%s2752_s4 + $0x38] sm:$0xff]  }
  0x42   :  { %1766 = vmatprep.mubr.msk.bf16.mxu0 %vm244_vm0, %v2045_v23  ;;  %1790 = vmatprep.mubr.msk.bf16.mxu1 %vm244_vm0, %v2047_v24 }
  0x43   :  { %957 = vmatpush1.bf16.msra.mxu0 %v2083_v50  ;;  %1162 = vmatpush1.bf16.msra.mxu1 %v2083_v50 }
  0x44   :  { %958 = vmatprep.subr.bf16.mxu0 %v2111_v0  ;;  %1163 = vmatprep.subr.bf16.mxu1 %v2111_v0 }
  0x47   :  { %959 = vmatpush1.bf16.msra.mxu0 %v2084_v51  ;;  %1164 = vmatpush1.bf16.msra.mxu1 %v2084_v51 }
  0x48   :  { %960 = vmatprep.subr.bf16.mxu0 %v2111_v0  ;;  %1165 = vmatprep.subr.bf16.mxu1 %v2111_v0 }
  0x49   :  { %318 = vmatmul.mubr.bf16.gmra.mrb[8].mxu0 %v2049_v25  ;;  %527 = vmatmul.mubr.bf16.gmra.mrb[8].mxu1 %v2050_v26 }
  0x4a   :  { %1767 = vmatprep.mubr.msk.bf16.mxu0 %vm244_vm0, %v2051_v27  ;;  %1791 = vmatprep.mubr.msk.bf16.mxu1 %vm244_vm0, %v2053_v28 }
  0x4b   :  { %961 = vmatpush1.bf16.msra.mxu0 %v2085_v52  ;;  %1166 = vmatpush1.bf16.msra.mxu1 %v2085_v52 }
  0x4c   :  { %962 = vmatprep.subr.bf16.mxu0 %v2111_v0  ;;  %1167 = vmatprep.subr.bf16.mxu1 %v2111_v0 }
  0x4f   :  { %963 = vmatpush1.bf16.msra.mxu0 %v2086_v53  ;;  %1168 = vmatpush1.bf16.msra.mxu1 %v2086_v53 }
  0x50   :  { %964 = vmatprep.subr.bf16.mxu0 %v2111_v0  ;;  %1169 = vmatprep.subr.bf16.mxu1 %v2111_v0 }
  0x51   :  { %326 = vmatmul.mubr.bf16.gmra.mrb[12].mxu0 %v2055_v29  ;;  %535 = vmatmul.mubr.bf16.gmra.mrb[12].mxu1 %v2056_v30 }
  0x52   :  { %1768 = vmatprep.mubr.msk.bf16.mxu0 %vm244_vm0, %v2057_v31  ;;  %1792 = vmatprep.mubr.msk.bf16.mxu1 %vm244_vm0, %v2059_v32 }
  0x53   :  { %965 = vmatpush1.bf16.msra.mxu0 %v2087_v54  ;;  %1170 = vmatpush1.bf16.msra.mxu1 %v2087_v54 }
  0x54   :  { %966 = vmatprep.subr.bf16.mxu0 %v2111_v0  ;;  %1171 = vmatprep.subr.bf16.mxu1 %v2111_v0 }
  0x57   :  { %967 = vmatpush1.bf16.msra.mxu0 %v2088_v21  ;;  %1172 = vmatpush1.bf16.msra.mxu1 %v2088_v21 }
  0x58   :  { %968 = vmatprep.subr.bf16.mxu0 %v2111_v0  ;;  %1173 = vmatprep.subr.bf16.mxu1 %v2111_v0 }
  0x59   :  { %334 = vmatmul.mubr.bf16.gmra.mrb[16].mxu0 %v2061_v33  ;;  %543 = vmatmul.mubr.bf16.gmra.mrb[16].mxu1 %v2062_v34  ;;  %v2089_v33 = vld [vmem:[%s2752_s4 + $0x40] sm:$0xff]  }
  0x5a   :  { %1769 = vmatprep.mubr.msk.bf16.mxu0 %vm244_vm0, %v2063_v35  ;;  %1793 = vmatprep.mubr.msk.bf16.mxu1 %vm244_vm0, %v2065_v36 }
  0x5b   :  { %969 = vmatpush1.bf16.msra.mxu0 %v2089_v33  ;;  %1174 = vmatpush1.bf16.msra.mxu1 %v2089_v33 }
  0x5c   :  { %970 = vmatprep.subr.bf16.mxu0 %v2111_v0  ;;  %1175 = vmatprep.subr.bf16.mxu1 %v2111_v0 }
  0x61   :  { %342 = vmatmul.mubr.bf16.gmra.mrb[20].mxu0 %v2067_v37  ;;  %551 = vmatmul.mubr.bf16.gmra.mrb[20].mxu1 %v2068_v38 }
  0x62   :  { %1770 = vmatprep.mubr.msk.bf16.mxu0 %vm244_vm0, %v2069_v39  ;;  %1794 = vmatprep.mubr.msk.bf16.mxu1 %vm244_vm0, %v2071_v40  ;;  %v2090_v39 = vld [vmem:[%s2752_s4 + $0x48] sm:$0xff]   ;;  %s2113_s4 = smov 64  }
  0x63   :  { %971 = vmatpush1.bf16.msra.mxu0 %v2090_v39  ;;  %1176 = vmatpush1.bf16.msra.mxu1 %v2090_v39 }
  0x64   :  { %1415 = vmatprep.subr.bf16.mxu0 %v2111_v0  ;;  %1502 = vmatprep.subr.bf16.mxu1 %v2111_v0 }
  0x69   :  { %350 = vmatmul.mubr.bf16.gmra.mrb[24].mxu0 %v2073_v41  ;;  %559 = vmatmul.mubr.bf16.gmra.mrb[24].mxu1 %v2074_v42 }
  0x6a   :  { %1771 = vmatprep.mubr.msk.bf16.mxu0 %vm244_vm0, %v2075_v43  ;;  %1795 = vmatprep.mubr.msk.bf16.mxu1 %vm244_vm0, %v2077_v44 }
  0x71   :  { %358 = vmatmul.mubr.bf16.gmra.mrb[28].mxu0 %v2079_v45  ;;  %567 = vmatmul.mubr.bf16.gmra.mrb[28].mxu1 %v2080_v46 }
 0x10c   :  { %v303_v55 = vpop.f32.mrb[0].mxu0  ;;  %v512_v56 = vpop.f32.mrb[0].mxu1 }
 0x10d   :  { %v575_v58 = vmax.f32 %v303_v55, %v512_v56  ;;  %v305_v59 = vpop.f32.mrb[1].mxu0  ;;  %v514_v60 = vpop.f32.mrb[1].mxu1 }
 0x10e   :  { %v306_v61 = vpop.f32.mrb[2].mxu0  ;;  %v515_v62 = vpop.f32.mrb[2].mxu1 }
 0x10f   :  { %v598_v63 = vadd.f32 %v2408_v57, %v575_v58  ;;  %v576_v1 = vmax.f32 %v306_v61, %v515_v62  ;;  %v308_v2 = vpop.f32.mrb[3].mxu0  ;;  %v517_v3 = vpop.f32.mrb[3].mxu1 }
 0x111   :  { %v614_v4 = vmax.f32 %v598_v63, 0.0  ;;  %v599_v5 = vadd.f32 %v2408_v57, %v576_v1 }
 0x113   :  { %636 = vst.msk [vmem:[#allocation2 + $0x2] sm:$0xff] %vm635_vm2, %v614_v4  ;;  %v615_v6 = vmax.f32 %v599_v5, 0.0 }
 0x114   :  { %v311_v7 = vpop.f32.mrb[4].mxu0  ;;  %v520_v8 = vpop.f32.mrb[4].mxu1 }
 0x115   :  { %637 = vst.msk [vmem:[#allocation2 + $0xa] sm:$0xff] %vm635_vm2, %v615_v6  ;;  %v577_v9 = vmax.f32 %v311_v7, %v520_v8  ;;  %v313_v10 = vpop.f32.mrb[5].mxu0  ;;  %v522_v11 = vpop.f32.mrb[5].mxu1 }
 0x116   :  { %v314_v12 = vpop.f32.mrb[6].mxu0  ;;  %v523_v13 = vpop.f32.mrb[6].mxu1 }
 0x117   :  { %v600_v14 = vadd.f32 %v2408_v57, %v577_v9  ;;  %v578_v15 = vmax.f32 %v314_v12, %v523_v13  ;;  %v316_v16 = vpop.f32.mrb[7].mxu0  ;;  %v525_v17 = vpop.f32.mrb[7].mxu1 }
 0x119   :  { %v616_v18 = vmax.f32 %v600_v14, 0.0  ;;  %v601_v19 = vadd.f32 %v2408_v57, %v578_v15 }
 0x11b   :  { %638 = vst.msk [vmem:[#allocation2 + $0x12] sm:$0xff] %vm635_vm2, %v616_v18  ;;  %v617_v20 = vmax.f32 %v601_v19, 0.0 }
 0x11c   :  { %v319_v22 = vpop.f32.mrb[8].mxu0  ;;  %v528_v23 = vpop.f32.mrb[8].mxu1  ;;  %v704_v37 = vld [vmem:[#allocation2 + $0x2] ss:$2 sm:$0xff]  ;;  %v2431_v38 = vld [vmem:[#allocation2 + $0x1] ss:$2 sm:$0xff] }
 0x11d   :  { %639 = vst.msk [vmem:[#allocation2 + $0x1a] sm:$0xff] %vm635_vm2, %v617_v20  ;;  %v579_v24 = vmax.f32 %v319_v22, %v528_v23  ;;  %v321_v25 = vpop.f32.mrb[9].mxu0  ;;  %v530_v26 = vpop.f32.mrb[9].mxu1  ;;  %v720_v58 = vld [vmem:[#allocation2 + $0x3] ss:$2 sm:$0xff] }
 0x11e   :  { %v322_v27 = vpop.f32.mrb[10].mxu0  ;;  %v531_v28 = vpop.f32.mrb[10].mxu1 }
 0x11f   :  { %v602_v29 = vadd.f32 %v2408_v57, %v579_v24  ;;  %v580_v30 = vmax.f32 %v322_v27, %v531_v28  ;;  %v324_v31 = vpop.f32.mrb[11].mxu0  ;;  %v533_v32 = vpop.f32.mrb[11].mxu1 }
 0x121   :  { %v618_v34 = vmax.f32 %v602_v29, 0.0  ;;  %v603_v35 = vadd.f32 %v2408_v57, %v580_v30 }
 0x122   :  { %v736_v62 = vld [vmem:[#allocation2 + $0x4] ss:$2 sm:$0xff]  ;;  %v1018_v1 = vld [vmem:[#allocation2 + $0x5] ss:$2 sm:$0xff] }
 0x123   :  { %640 = vst.msk [vmem:[#allocation2 + $0x22] sm:$0xff] %vm635_vm2, %v618_v34  ;;  %v619_v36 = vmax.f32 %v603_v35, 0.0 }
 0x124   :  { %v327_v40 = vpop.f32.mrb[12].mxu0  ;;  %v536_v41 = vpop.f32.mrb[12].mxu1  ;;  %v706_v42 = vld [vmem:[#allocation2 + $0x12] ss:$2 sm:$0xff]  ;;  %v2436_v43 = vld [vmem:[#allocation2 + $0x11] ss:$2 sm:$0xff] }
 0x125   :  { %641 = vst.msk [vmem:[#allocation2 + $0x2a] sm:$0xff] %vm635_vm2, %v619_v36  ;;  %v581_v44 = vmax.f32 %v327_v40, %v536_v41  ;;  %v329_v45 = vpop.f32.mrb[13].mxu0  ;;  %v538_v46 = vpop.f32.mrb[13].mxu1  ;;  %v1889_v48 = vpack.i.bf16 %v706_v42, %v704_v37  ;;  %v1879_v49 = vpack.i.bf16 %v2436_v43, %v2431_v38  ;;  %v722_v52 = vld [vmem:[#allocation2 + $0x13] ss:$2 sm:$0xff] }
 0x126   :  { %v330_v50 = vpop.f32.mrb[14].mxu0  ;;  %v539_v51 = vpop.f32.mrb[14].mxu1  ;;  %v1894_v61 = vpack.i.bf16 %v722_v52, %v720_v58 }
 0x127   :  { %v604_v53 = vadd.f32 %v2408_v57, %v581_v44  ;;  %v582_v54 = vmax.f32 %v330_v50, %v539_v51  ;;  %v541_v55 = vpop.f32.mrb[15].mxu1  ;;  %1890 = vrot.lane.b32.xlu1 %v1889_v48, %s2113_s4  ;;  %1880 = vrot.lane.b32.xlu0 %v1879_v49, %s2114_s20  ;;  %v332_v56 = vpop.f32.mrb[15].mxu0 }
 0x129   :  { %v620_v59 = vmax.f32 %v604_v53, 0.0  ;;  %v605_v60 = vadd.f32 %v2408_v57, %v582_v54 }
 0x12a   :  { %v738_v63 = vld [vmem:[#allocation2 + $0x14] ss:$2 sm:$0xff]  ;;  %v1020_v2 = vld [vmem:[#allocation2 + $0x15] ss:$2 sm:$0xff] }
 0x12b   :  { %642 = vst.msk [vmem:[#allocation2 + $0x32] sm:$0xff] %vm635_vm2, %v620_v59  ;;  %v621_v3 = vmax.f32 %v605_v60, 0.0  ;;  %1895 = vrot.lane.b32.xlu1 %v1894_v61, %s2113_s4  ;;  %1885 = vrot.lane.b32.xlu0 %v1889_v48, %s2114_s20  ;;  %v873_v4 = vpack.c.bf16 %v738_v63, %v736_v62  ;;  %v1138_v5 = vpack.c.bf16 %v1020_v2, %v1018_v1 }
 0x12c   :  { %v335_v6 = vpop.f32.mrb[16].mxu0  ;;  %v544_v7 = vpop.f32.mrb[16].mxu1  ;;  %v1904_v11 = vpack.i.bf16 %v738_v63, %v736_v62  ;;  %v708_v21 = vld [vmem:[#allocation2 + $0x22] ss:$2 sm:$0xff]  ;;  %v2458_v22 = vld [vmem:[#allocation2 + $0x21] ss:$2 sm:$0xff] }
 0x12d   :  { %643 = vst.msk [vmem:[#allocation2 + $0x3a] sm:$0xff] %vm635_vm2, %v621_v3  ;;  %v583_v8 = vmax.f32 %v335_v6, %v544_v7  ;;  %v337_v9 = vpop.f32.mrb[17].mxu0  ;;  %v546_v10 = vpop.f32.mrb[17].mxu1  ;;  %1807 = vmatprep.mubr.msk.bf16.mxu0 %vm635_vm2, %v873_v4  ;;  %1811 = vmatprep.mubr.msk.bf16.mxu1 %vm635_vm2, %v1138_v5  ;;  %v724_v44 = vld [vmem:[#allocation2 + $0x23] ss:$2 sm:$0xff] }
 0x12e   :  { %v338_v12 = vpop.f32.mrb[18].mxu0  ;;  %v547_v13 = vpop.f32.mrb[18].mxu1 }
 0x12f   :  { %v606_v14 = vadd.f32 %v2408_v57, %v583_v8  ;;  %v584_v15 = vmax.f32 %v338_v12, %v547_v13  ;;  %v549_v16 = vpop.f32.mrb[19].mxu1  ;;  %1900 = vrot.lane.b32.xlu0 %v1894_v61, %s2115_s21  ;;  %1905 = vrot.lane.b32.xlu1 %v1904_v11, %s2115_s21  ;;  %v340_v17 = vpop.f32.mrb[19].mxu0 }
 0x131   :  { %v622_v18 = vmax.f32 %v606_v14, 0.0  ;;  %v607_v19 = vadd.f32 %v2408_v57, %v584_v15 }
 0x132   :  { %v2465_v32 = vld [vmem:[#allocation2 + $0x24] ss:$2 sm:$0xff] }
 0x133   :  { %644 = vst.msk [vmem:[#allocation2 + $0x4a] sm:$0xff] %vm635_vm2, %v622_v18  ;;  %v623_v20 = vmax.f32 %v607_v19, 0.0 }
 0x134   :  { %v343_v23 = vpop.f32.mrb[20].mxu0  ;;  %v552_v24 = vpop.f32.mrb[20].mxu1  ;;  %v710_v25 = vld [vmem:[#allocation2 + $0x32] ss:$2 sm:$0xff]  ;;  %v2460_v26 = vld [vmem:[#allocation2 + $0x31] ss:$2 sm:$0xff] }
 0x135   :  { %645 = vst.msk [vmem:[#allocation2 + $0x52] sm:$0xff] %vm635_vm2, %v623_v20  ;;  %v585_v27 = vmax.f32 %v343_v23, %v552_v24  ;;  %v345_v28 = vpop.f32.mrb[21].mxu0  ;;  %v554_v29 = vpop.f32.mrb[21].mxu1  ;;  %v1914_v30 = vpack.i.bf16 %v710_v25, %v708_v21  ;;  %v1909_v31 = vpack.i.bf16 %v2460_v26, %v2458_v22  ;;  %v2467_v33 = vld [vmem:[#allocation2 + $0x34] ss:$2 sm:$0xff] }
 0x136   :  { %v346_v34 = vpop.f32.mrb[22].mxu0  ;;  %v555_v35 = vpop.f32.mrb[22].mxu1  ;;  %v726_v36 = vld [vmem:[#allocation2 + $0x33] ss:$2 sm:$0xff]  ;;  %v875_v37 = vpack.c.bf16 %v2467_v33, %v2465_v32  ;;  %v1934_v55 = vpack.i.bf16 %v2467_v33, %v2465_v32 }
 0x137   :  { %v608_v39 = vadd.f32 %v2408_v57, %v585_v27  ;;  %v586_v40 = vmax.f32 %v346_v34, %v555_v35  ;;  %v557_v41 = vpop.f32.mrb[23].mxu1  ;;  %1915 = vrot.lane.b32.xlu1 %v1914_v30, %s2114_s20  ;;  %1910 = vrot.lane.b32.xlu0 %v1909_v31, %s2114_s20  ;;  %v348_v42 = vpop.f32.mrb[23].mxu0  ;;  %v1924_v48 = vpack.i.bf16 %v726_v36, %v724_v44 }
 0x139   :  { %v624_v45 = vmax.f32 %v608_v39, 0.0  ;;  %v609_v46 = vadd.f32 %v2408_v57, %v586_v40 }
 0x13b   :  { %646 = vst.msk [vmem:[#allocation2 + $0x5a] sm:$0xff] %vm635_vm2, %v624_v45  ;;  %v625_v49 = vmax.f32 %v609_v46, 0.0  ;;  %1925 = vrot.lane.b32.xlu1 %v1924_v48, %s2113_s4  ;;  %1920 = vrot.lane.b32.xlu0 %v1914_v30, %s2113_s4 }
 0x13c   :  { %v351_v50 = vpop.f32.mrb[24].mxu0  ;;  %v560_v51 = vpop.f32.mrb[24].mxu1  ;;  %v712_v3 = vld [vmem:[#allocation2 + $0x4a] ss:$2 sm:$0xff]  ;;  %v2486_v4 = vld [vmem:[#allocation2 + $0x49] ss:$2 sm:$0xff] }
 0x13d   :  { %647 = vst.msk [vmem:[#allocation2 + $0x62] sm:$0xff] %vm635_vm2, %v625_v49  ;;  %v587_v52 = vmax.f32 %v351_v50, %v560_v51  ;;  %v353_v53 = vpop.f32.mrb[25].mxu0  ;;  %v562_v54 = vpop.f32.mrb[25].mxu1  ;;  %v728_v21 = vld [vmem:[#allocation2 + $0x4b] ss:$2 sm:$0xff] }
 0x13e   :  { %v354_v56 = vpop.f32.mrb[26].mxu0  ;;  %v563_v58 = vpop.f32.mrb[26].mxu1 }
 0x13f   :  { %v610_v59 = vadd.f32 %v2408_v57, %v587_v52  ;;  %v588_v60 = vmax.f32 %v354_v56, %v563_v58  ;;  %v565_v61 = vpop.f32.mrb[27].mxu1  ;;  %1935 = vrot.lane.b32.xlu1 %v1934_v55, %s2115_s21  ;;  %1930 = vrot.lane.b32.xlu0 %v1924_v48, %s2115_s21  ;;  %v356_v62 = vpop.f32.mrb[27].mxu0 }
 0x140   :  { %v672_v61 = vld [vmem:[#allocation2] ss:$2 sm:$0xff]  ;;  %v674_v62 = vld [vmem:[#allocation2 + $0x10] ss:$2 sm:$0xff] }
 0x141   :  { %v626_v63 = vmax.f32 %v610_v59, 0.0  ;;  %v611_v1 = vadd.f32 %v2408_v57, %v588_v60 }
 0x142   :  { %v2497_v27 = vld [vmem:[#allocation2 + $0x4c] ss:$2 sm:$0xff] }
 0x143   :  { %648 = vst.msk [vmem:[#allocation2 + $0x6a] sm:$0xff] %vm635_vm2, %v626_v63  ;;  %v627_v2 = vmax.f32 %v611_v1, 0.0 }
 0x144   :  { %v359_v5 = vpop.f32.mrb[28].mxu0  ;;  %v568_v6 = vpop.f32.mrb[28].mxu1  ;;  %v714_v7 = vld [vmem:[#allocation2 + $0x5a] ss:$2 sm:$0xff]  ;;  %v2488_v8 = vld [vmem:[#allocation2 + $0x59] ss:$2 sm:$0xff] }
 0x145   :  { %649 = vst.msk [vmem:[#allocation2 + $0x72] sm:$0xff] %vm635_vm2, %v627_v2  ;;  %v589_v9 = vmax.f32 %v359_v5, %v568_v6  ;;  %v361_v10 = vpop.f32.mrb[29].mxu0  ;;  %v570_v11 = vpop.f32.mrb[29].mxu1  ;;  %v1944_v12 = vpack.i.bf16 %v714_v7, %v712_v3  ;;  %v1939_v13 = vpack.i.bf16 %v2488_v8, %v2486_v4  ;;  %v730_v16 = vld [vmem:[#allocation2 + $0x5b] ss:$2 sm:$0xff] }
 0x146   :  { %v362_v14 = vpop.f32.mrb[30].mxu0  ;;  %v571_v15 = vpop.f32.mrb[30].mxu1  ;;  %v1954_v25 = vpack.i.bf16 %v730_v16, %v728_v21 }
 0x147   :  { %v612_v17 = vadd.f32 %v2408_v57, %v589_v9  ;;  %v590_v18 = vmax.f32 %v362_v14, %v571_v15  ;;  %v573_v19 = vpop.f32.mrb[31].mxu1  ;;  %1945 = vrot.lane.b32.xlu1 %v1944_v12, %s2114_s20  ;;  %1940 = vrot.lane.b32.xlu0 %v1939_v13, %s2114_s20  ;;  %v364_v20 = vpop.f32.mrb[31].mxu0 }
 0x149   :  { %v628_v23 = vmax.f32 %v612_v17, 0.0  ;;  %v613_v24 = vadd.f32 %v2408_v57, %v590_v18  ;;  %v1024_v18 = vld [vmem:[#allocation2 + $0x35] ss:$2 sm:$0xff] }
 0x14a   :  { %v2499_v28 = vld [vmem:[#allocation2 + $0x5c] ss:$2 sm:$0xff] }
 0x14b   :  { %650 = vst.msk [vmem:[#allocation2 + $0x7a] sm:$0xff] %vm635_vm2, %v628_v23  ;;  %v629_v29 = vmax.f32 %v613_v24, 0.0  ;;  %1955 = vrot.lane.b32.xlu1 %v1954_v25, %s2113_s4  ;;  %1950 = vrot.lane.b32.xlu0 %v1944_v12, %s2113_s4  ;;  %v877_v30 = vpack.c.bf16 %v2499_v28, %v2497_v27  ;;  %v1964_v57 = vpack.i.bf16 %v2499_v28, %v2497_v27  ;;  %v1022_v24 = vld [vmem:[#allocation2 + $0x25] ss:$2 sm:$0xff] }
 0x14c   :  { %v716_v31 = vld [vmem:[#allocation2 + $0x6a] ss:$2 sm:$0xff]  ;;  %v2511_v35 = vld [vmem:[#allocation2 + $0x69] ss:$2 sm:$0xff] }
 0x14d   :  { %651 = vst.msk [vmem:[#allocation2 + $0x82] sm:$0xff] %vm635_vm2, %v629_v29  ;;  %v732_v46 = vld [vmem:[#allocation2 + $0x6b] ss:$2 sm:$0xff] }
 0x14f   :  { %1960 = vrot.lane.b32.xlu0 %v1954_v25, %s2115_s21  ;;  %1965 = vrot.lane.b32.xlu1 %v1964_v57, %s2115_s21  ;;  %v1140_v25 = vpack.c.bf16 %v1024_v18, %v1022_v24  ;;  %v682_v24 = vld [vmem:[#allocation2 + $0x58] ss:$2 sm:$0xff] }
 0x152   :  { %v2517_v41 = vld [vmem:[#allocation2 + $0x6c] ss:$2 sm:$0xff] }
 0x154   :  { %v718_v34 = vld [vmem:[#allocation2 + $0x7a] ss:$2 sm:$0xff]  ;;  %v2513_v36 = vld [vmem:[#allocation2 + $0x79] ss:$2 sm:$0xff] }
 0x155   :  { %v1974_v39 = vpack.i.bf16 %v718_v34, %v716_v31  ;;  %v1969_v40 = vpack.i.bf16 %v2513_v36, %v2511_v35  ;;  %v2519_v42 = vld [vmem:[#allocation2 + $0x7c] ss:$2 sm:$0xff]  ;;  %v734_v44 = vld [vmem:[#allocation2 + $0x7b] ss:$2 sm:$0xff] }
 0x156   :  { %v879_v45 = vpack.c.bf16 %v2519_v42, %v2517_v41  ;;  %v1984_v48 = vpack.i.bf16 %v734_v44, %v732_v46  ;;  %v1994_v49 = vpack.i.bf16 %v2519_v42, %v2517_v41 }
 0x157   :  { %1975 = vrot.lane.b32.xlu1 %v1974_v39, %s2114_s20  ;;  %1970 = vrot.lane.b32.xlu0 %v1969_v40, %s2114_s20 }
 0x15b   :  { %1985 = vrot.lane.b32.xlu1 %v1984_v48, %s2113_s4  ;;  %1980 = vrot.lane.b32.xlu0 %v1974_v39, %s2113_s4 }
 0x15f   :  { %1995 = vrot.lane.b32.xlu1 %v1994_v49, %s2115_s21  ;;  %1990 = vrot.lane.b32.xlu0 %v1984_v48, %s2115_s21 }
 0x199   :  { %v1891_v50 = vpop.permute.xlu1 %1890  ;;  %v1881_v51 = vpop.permute.xlu0 %1880 }
 0x19a   :  { %v1883_v52 = vunpack.i.h.bf16 %v1881_v51  ;;  %v1882_v53 = vunpack.i.l.bf16 %v1881_v51  ;;  %v1893_v59 = vunpack.i.h.bf16 %v1891_v50  ;;  %v1892_v60 = vunpack.i.l.bf16 %v1891_v50 }
 0x19c   :  { %v847_v2 = vsel %vm635_vm2, %v672_v61, %v1882_v53  ;;  %v848_v3 = vsel %vm635_vm2, %v674_v62, %v1883_v52  ;;  %v676_v52 = vld [vmem:[#allocation2 + $0x20] ss:$2 sm:$0xff]  ;;  %v678_v53 = vld [vmem:[#allocation2 + $0x30] ss:$2 sm:$0xff] }
 0x19d   :  { %v1896_v54 = vpop.permute.xlu1 %1895  ;;  %v1886_v55 = vpop.permute.xlu0 %1885  ;;  %v856_v14 = vsel %vm855_vm3, %v847_v2, %v1892_v60  ;;  %v857_v15 = vsel %vm855_vm3, %v848_v3, %v1893_v59  ;;  %v1028_v2 = vld [vmem:[#allocation2 + $0x5d] ss:$2 sm:$0xff] }
 0x19e   :  { %v1888_v56 = vunpack.i.h.bf16 %v1886_v55  ;;  %v1887_v58 = vunpack.i.l.bf16 %v1886_v55  ;;  %v1898_v63 = vunpack.i.h.bf16 %v1896_v54  ;;  %v1897_v1 = vunpack.i.l.bf16 %v1896_v54 }
 0x1a0   :  { %v1114_v5 = vsel %vm635_vm2, %v2436_v43, %v1888_v56  ;;  %v1113_v6 = vsel %vm635_vm2, %v2431_v38, %v1887_v58 }
 0x1a1   :  { %v1901_v7 = vpop.permute.xlu0 %1900  ;;  %v1906_v9 = vpop.permute.xlu1 %1905  ;;  %v1121_v16 = vsel %vm855_vm3, %v1113_v6, %v1897_v1  ;;  %v1122_v17 = vsel %vm855_vm3, %v1114_v5, %v1898_v63 }
 0x1a2   :  { %v1903_v10 = vunpack.i.h.bf16 %v1901_v7  ;;  %v1902_v11 = vunpack.i.l.bf16 %v1901_v7  ;;  %v1908_v12 = vunpack.i.h.bf16 %v1906_v9  ;;  %v1907_v13 = vunpack.i.l.bf16 %v1906_v9 }
 0x1a4   :  { %v864_v43 = vsel %vm244_vm0, %v856_v14, %v1902_v11  ;;  %v865_v19 = vsel %vm244_vm0, %v857_v15, %v1903_v10  ;;  %v1130_v38 = vsel %vm244_vm0, %v1122_v17, %v1908_v12  ;;  %v1129_v20 = vsel %vm244_vm0, %v1121_v16, %v1907_v13  ;;  %v1026_v10 = vld [vmem:[#allocation2 + $0x4d] ss:$2 sm:$0xff] }
 0x1a5   :  { %v872_v21 = vpack.c.bf16 %v865_v19, %v864_v43  ;;  %v1137_v23 = vpack.c.bf16 %v1130_v38, %v1129_v20  ;;  %v1142_v11 = vpack.c.bf16 %v1028_v2, %v1026_v10 }
 0x1a7   :  { %985 = vmatmul.mubr.bf16.vlgmr.msra.gmra.mrb[32].mxu0 %v872_v21  ;;  %1190 = vmatmul.mubr.bf16.vlgmr.msra.gmra.mrb[32].mxu1 %v1137_v23  ;;  %v680_v23 = vld [vmem:[#allocation2 + $0x48] ss:$2 sm:$0xff] }
 0x1a8   :  { %1808 = vmatprep.mubr.msk.bf16.mxu0 %vm635_vm2, %v875_v37  ;;  %1812 = vmatprep.mubr.msk.bf16.mxu1 %vm635_vm2, %v1140_v25 }
 0x1a9   :  { %v1916_v29 = vpop.permute.xlu1 %1915  ;;  %v1911_v57 = vpop.permute.xlu0 %1910 }
 0x1aa   :  { %v1918_v31 = vunpack.i.h.bf16 %v1916_v29  ;;  %v1917_v34 = vunpack.i.l.bf16 %v1916_v29  ;;  %v1913_v39 = vunpack.i.h.bf16 %v1911_v57  ;;  %v1912_v40 = vunpack.i.l.bf16 %v1911_v57 }
 0x1ac   :  { %v1115_v32 = vsel %vm635_vm2, %v2458_v22, %v1917_v34  ;;  %v1116_v33 = vsel %vm635_vm2, %v2460_v26, %v1918_v31  ;;  %v849_v37 = vsel %vm635_vm2, %v676_v52, %v1912_v40  ;;  %v850_v54 = vsel %vm635_vm2, %v678_v53, %v1913_v39 }
 0x1ad   :  { %v1926_v44 = vpop.permute.xlu1 %1925  ;;  %v1921_v46 = vpop.permute.xlu0 %1920 }
 0x1ae   :  { %v1928_v48 = vunpack.i.h.bf16 %v1926_v44  ;;  %v1927_v49 = vunpack.i.l.bf16 %v1926_v44  ;;  %v1923_v50 = vunpack.i.h.bf16 %v1921_v46  ;;  %v1922_v51 = vunpack.i.l.bf16 %v1921_v46 }
 0x1b0   :  { %v1123_v62 = vsel %vm855_vm3, %v1115_v32, %v1927_v49  ;;  %v1124_v63 = vsel %vm855_vm3, %v1116_v33, %v1928_v48  ;;  %v858_v1 = vsel %vm855_vm3, %v849_v37, %v1922_v51  ;;  %v859_v22 = vsel %vm855_vm3, %v850_v54, %v1923_v50  ;;  %v1032_v49 = vld [vmem:[#allocation2 + $0x7d] ss:$2 sm:$0xff]  ;;  %v1030_v33 = vld [vmem:[#allocation2 + $0x6d] ss:$2 sm:$0xff] }
 0x1b1   :  { %v1936_v55 = vpop.permute.xlu1 %1935  ;;  %v1931_v56 = vpop.permute.xlu0 %1930  ;;  %v1144_v37 = vpack.c.bf16 %v1032_v49, %v1030_v33 }
 0x1b2   :  { %v1938_v58 = vunpack.i.h.bf16 %v1936_v55  ;;  %v1937_v59 = vunpack.i.l.bf16 %v1936_v55  ;;  %v1933_v60 = vunpack.i.h.bf16 %v1931_v56  ;;  %v1932_v61 = vunpack.i.l.bf16 %v1931_v56 }
 0x1b4   :  { %v866_v26 = vsel %vm244_vm0, %v858_v1, %v1932_v61  ;;  %v867_v3 = vsel %vm244_vm0, %v859_v22, %v1933_v60  ;;  %v1131_v5 = vsel %vm244_vm0, %v1123_v62, %v1937_v59  ;;  %v1132_v6 = vsel %vm244_vm0, %v1124_v63, %v1938_v58 }
 0x1b5   :  { %v874_v7 = vpack.c.bf16 %v867_v3, %v866_v26  ;;  %v1139_v9 = vpack.c.bf16 %v1132_v6, %v1131_v5  ;;  %v684_v26 = vld [vmem:[#allocation2 + $0x68] ss:$2 sm:$0xff]  ;;  %v686_v3 = vld [vmem:[#allocation2 + $0x78] ss:$2 sm:$0xff] }
 0x1b7   :  { %993 = vmatmul.mubr.bf16.gmra.mrb[36].mxu0 %v874_v7  ;;  %1198 = vmatmul.mubr.bf16.gmra.mrb[36].mxu1 %v1139_v9 }
 0x1b8   :  { %1809 = vmatprep.mubr.msk.bf16.mxu0 %vm635_vm2, %v877_v30  ;;  %1813 = vmatprep.mubr.msk.bf16.mxu1 %vm635_vm2, %v1142_v11 }
 0x1b9   :  { %v1946_v12 = vpop.permute.xlu1 %1945  ;;  %v1941_v13 = vpop.permute.xlu0 %1940 }
 0x1ba   :  { %v1948_v14 = vunpack.i.h.bf16 %v1946_v12  ;;  %v1947_v15 = vunpack.i.l.bf16 %v1946_v12  ;;  %v1943_v16 = vunpack.i.h.bf16 %v1941_v13  ;;  %v1942_v17 = vunpack.i.l.bf16 %v1941_v13 }
 0x1bc   :  { %v1117_v27 = vsel %vm635_vm2, %v2486_v4, %v1947_v15  ;;  %v1118_v28 = vsel %vm635_vm2, %v2488_v8, %v1948_v14  ;;  %v851_v30 = vsel %vm635_vm2, %v680_v23, %v1942_v17  ;;  %v852_v25 = vsel %vm635_vm2, %v682_v24, %v1943_v16  ;;  %v2094_v23 = vld [vmem:[%s2754_s6 + $0x18] sm:$0xff]   ;;  %v2095_v24 = vld [vmem:[%s2754_s6 + $0x20] sm:$0xff]  }
 0x1bd   :  { %v1956_v18 = vpop.permute.xlu1 %1955  ;;  %v1951_v43 = vpop.permute.xlu0 %1950 }
 0x1be   :  { %v1958_v19 = vunpack.i.h.bf16 %v1956_v18  ;;  %v1957_v38 = vunpack.i.l.bf16 %v1956_v18  ;;  %v1953_v20 = vunpack.i.h.bf16 %v1951_v43  ;;  %v1952_v21 = vunpack.i.l.bf16 %v1951_v43 }
 0x1c0   :  { %v1125_v44 = vsel %vm855_vm3, %v1117_v27, %v1957_v38  ;;  %v1126_v46 = vsel %vm855_vm3, %v1118_v28, %v1958_v19  ;;  %v860_v48 = vsel %vm855_vm3, %v851_v30, %v1952_v21  ;;  %v861_v4 = vsel %vm855_vm3, %v852_v25, %v1953_v20  ;;  %v2091_v38 = vld [vmem:[%s2754_s6] sm:$0xff]   ;;  %v2092_v20 = vld [vmem:[%s2754_s6 + $0x8] sm:$0xff]   ;;  %v2093_v21 = vld [vmem:[%s2754_s6 + $0x10] sm:$0xff]  }
 0x1c1   :  { %v1961_v29 = vpop.permute.xlu0 %1960  ;;  %v1966_v57 = vpop.permute.xlu1 %1965  ;;  %1416 = vmatpush1.bf16.msra.mxu0 %v2091_v38  ;;  %1503 = vmatpush1.bf16.msra.mxu1 %v2091_v38  ;;  %v2096_v27 = vld [vmem:[%s2754_s6 + $0x28] sm:$0xff]   ;;  %v2097_v28 = vld [vmem:[%s2754_s6 + $0x30] sm:$0xff]   ;;  %v2098_v30 = vld [vmem:[%s2754_s6 + $0x38] sm:$0xff]  }
 0x1c2   :  { %v1963_v31 = vunpack.i.h.bf16 %v1961_v29  ;;  %v1962_v34 = vunpack.i.l.bf16 %v1961_v29  ;;  %v1968_v39 = vunpack.i.h.bf16 %v1966_v57  ;;  %v1967_v40 = vunpack.i.l.bf16 %v1966_v57  ;;  %1417 = vmatprep.subr.bf16.mxu0 %v2111_v0  ;;  %1504 = vmatprep.subr.bf16.mxu1 %v2111_v0  ;;  %v2099_v25 = vld [vmem:[%s2754_s6 + $0x40] sm:$0xff]   ;;  %v2100_v29 = vld [vmem:[%s2754_s6 + $0x48] sm:$0xff]   ;;  %v2101_v57 = vld [vmem:[%s2754_s6 + $0x50] sm:$0xff]  }
 0x1c4   :  { %v868_v8 = vsel %vm244_vm0, %v860_v48, %v1962_v34  ;;  %v869_v50 = vsel %vm244_vm0, %v861_v4, %v1963_v31  ;;  %v1133_v51 = vsel %vm244_vm0, %v1125_v44, %v1967_v40  ;;  %v1134_v52 = vsel %vm244_vm0, %v1126_v46, %v1968_v39  ;;  %v2664_v39 = vld [vmem:[%s2755_s5] ss:$0 sm:$0xff] }
 0x1c5   :  { %v876_v53 = vpack.c.bf16 %v869_v50, %v868_v8  ;;  %v1141_v32 = vpack.c.bf16 %v1134_v52, %v1133_v51  ;;  %1418 = vmatpush1.bf16.msra.mxu0 %v2092_v20  ;;  %1505 = vmatpush1.bf16.msra.mxu1 %v2092_v20 }
 0x1c6   :  { %1419 = vmatprep.subr.bf16.mxu0 %v2111_v0  ;;  %1506 = vmatprep.subr.bf16.mxu1 %v2111_v0 }
 0x1c7   :  { %1001 = vmatmul.mubr.bf16.gmra.mrb[40].mxu0 %v876_v53  ;;  %1206 = vmatmul.mubr.bf16.gmra.mrb[40].mxu1 %v1141_v32 }
 0x1c8   :  { %1810 = vmatprep.mubr.msk.bf16.mxu0 %vm635_vm2, %v879_v45  ;;  %1814 = vmatprep.mubr.msk.bf16.mxu1 %vm635_vm2, %v1144_v37 }
 0x1c9   :  { %v1976_v54 = vpop.permute.xlu1 %1975  ;;  %v1971_v55 = vpop.permute.xlu0 %1970  ;;  %1420 = vmatpush1.bf16.msra.mxu0 %v2093_v21  ;;  %1507 = vmatpush1.bf16.msra.mxu1 %v2093_v21 }
 0x1ca   :  { %v1978_v56 = vunpack.i.h.bf16 %v1976_v54  ;;  %v1977_v58 = vunpack.i.l.bf16 %v1976_v54  ;;  %v1973_v59 = vunpack.i.h.bf16 %v1971_v55  ;;  %v1972_v60 = vunpack.i.l.bf16 %v1971_v55  ;;  %1421 = vmatprep.subr.bf16.mxu0 %v2111_v0  ;;  %1508 = vmatprep.subr.bf16.mxu1 %v2111_v0 }
 0x1cc   :  { %v1119_v41 = vsel %vm635_vm2, %v2511_v35, %v1977_v58  ;;  %v1120_v42 = vsel %vm635_vm2, %v2513_v36, %v1978_v56  ;;  %v853_v45 = vsel %vm635_vm2, %v684_v26, %v1972_v60  ;;  %v854_v5 = vsel %vm635_vm2, %v686_v3, %v1973_v59 }
 0x1cd   :  { %v1986_v61 = vpop.permute.xlu1 %1985  ;;  %v1981_v62 = vpop.permute.xlu0 %1980  ;;  %1422 = vmatpush1.bf16.msra.mxu0 %v2094_v23  ;;  %1509 = vmatpush1.bf16.msra.mxu1 %v2094_v23 }
 0x1ce   :  { %v1988_v63 = vunpack.i.h.bf16 %v1986_v61  ;;  %v1987_v1 = vunpack.i.l.bf16 %v1986_v61  ;;  %v1983_v22 = vunpack.i.h.bf16 %v1981_v62  ;;  %v1982_v2 = vunpack.i.l.bf16 %v1981_v62  ;;  %1423 = vmatprep.subr.bf16.mxu0 %v2111_v0  ;;  %1510 = vmatprep.subr.bf16.mxu1 %v2111_v0 }
 0x1d0   :  { %v1127_v13 = vsel %vm855_vm3, %v1119_v41, %v1987_v1  ;;  %v1128_v14 = vsel %vm855_vm3, %v1120_v42, %v1988_v63  ;;  %v862_v15 = vsel %vm855_vm3, %v853_v45, %v1982_v2  ;;  %v863_v35 = vsel %vm855_vm3, %v854_v5, %v1983_v22  ;;  %v2102_v2 = vld [vmem:[%s2754_s6 + $0x58] sm:$0xff]  }
 0x1d1   :  { %v1996_v6 = vpop.permute.xlu1 %1995  ;;  %v1991_v7 = vpop.permute.xlu0 %1990  ;;  %1424 = vmatpush1.bf16.msra.mxu0 %v2095_v24  ;;  %1511 = vmatpush1.bf16.msra.mxu1 %v2095_v24 }
 0x1d2   :  { %v1998_v9 = vunpack.i.h.bf16 %v1996_v6  ;;  %v1997_v10 = vunpack.i.l.bf16 %v1996_v6  ;;  %v1993_v11 = vunpack.i.h.bf16 %v1991_v7  ;;  %v1992_v12 = vunpack.i.l.bf16 %v1991_v7  ;;  %1425 = vmatprep.subr.bf16.mxu0 %v2111_v0  ;;  %1512 = vmatprep.subr.bf16.mxu1 %v2111_v0 }
 0x1d4   :  { %v870_v36 = vsel %vm244_vm0, %v862_v15, %v1992_v12  ;;  %v871_v16 = vsel %vm244_vm0, %v863_v35, %v1993_v11  ;;  %v1135_v17 = vsel %vm244_vm0, %v1127_v13, %v1997_v10  ;;  %v1136_v18 = vsel %vm244_vm0, %v1128_v14, %v1998_v9 }
 0x1d5   :  { %v878_v43 = vpack.c.bf16 %v871_v16, %v870_v36  ;;  %v1143_v19 = vpack.c.bf16 %v1136_v18, %v1135_v17  ;;  %1426 = vmatpush1.bf16.msra.mxu0 %v2096_v27  ;;  %1513 = vmatpush1.bf16.msra.mxu1 %v2096_v27 }
 0x1d6   :  { %1427 = vmatprep.subr.bf16.mxu0 %v2111_v0  ;;  %1514 = vmatprep.subr.bf16.mxu1 %v2111_v0 }
 0x1d7   :  { %1009 = vmatmul.mubr.bf16.gmra.mrb[44].mxu0 %v878_v43  ;;  %1214 = vmatmul.mubr.bf16.gmra.mrb[44].mxu1 %v1143_v19 }
 0x1d9   :  { %1428 = vmatpush1.bf16.msra.mxu0 %v2097_v28  ;;  %1515 = vmatpush1.bf16.msra.mxu1 %v2097_v28 }
 0x1da   :  { %1429 = vmatprep.subr.bf16.mxu0 %v2111_v0  ;;  %1516 = vmatprep.subr.bf16.mxu1 %v2111_v0 }
 0x1dd   :  { %1430 = vmatpush1.bf16.msra.mxu0 %v2098_v30  ;;  %1517 = vmatpush1.bf16.msra.mxu1 %v2098_v30 }
 0x1de   :  { %1431 = vmatprep.subr.bf16.mxu0 %v2111_v0  ;;  %1518 = vmatprep.subr.bf16.mxu1 %v2111_v0 }
 0x1e1   :  { %1432 = vmatpush1.bf16.msra.mxu0 %v2099_v25  ;;  %1519 = vmatpush1.bf16.msra.mxu1 %v2099_v25 }
 0x1e2   :  { %1433 = vmatprep.subr.bf16.mxu0 %v2111_v0  ;;  %1520 = vmatprep.subr.bf16.mxu1 %v2111_v0 }
 0x1e5   :  { %1434 = vmatpush1.bf16.msra.mxu0 %v2100_v29  ;;  %1521 = vmatpush1.bf16.msra.mxu1 %v2100_v29 }
 0x1e6   :  { %1435 = vmatprep.subr.bf16.mxu0 %v2111_v0  ;;  %1522 = vmatprep.subr.bf16.mxu1 %v2111_v0 }
 0x1e9   :  { %1436 = vmatpush1.bf16.msra.mxu0 %v2101_v57  ;;  %1523 = vmatpush1.bf16.msra.mxu1 %v2101_v57 }
 0x1ea   :  { %1437 = vmatprep.subr.bf16.mxu0 %v2111_v0  ;;  %1524 = vmatprep.subr.bf16.mxu1 %v2111_v0 }
 0x1ed   :  { %1438 = vmatpush1.bf16.msra.mxu0 %v2102_v2  ;;  %1525 = vmatpush1.bf16.msra.mxu1 %v2102_v2 }
 0x1ee   :  { %1853 = vmatprep.subr.bf16.mxu0 %v2112_v47 }
 0x27a   :  { %v986_v31 = vpop.f32.mrb[32].mxu0  ;;  %v1191_v34 = vpop.f32.mrb[32].mxu1 }
 0x27b   :  { %v1222_v40 = vmax.f32 %v986_v31, %v1191_v34  ;;  %v988_v44 = vpop.f32.mrb[33].mxu0  ;;  %v1193_v46 = vpop.f32.mrb[33].mxu1 }
 0x27c   :  { %v989_v48 = vpop.f32.mrb[34].mxu0  ;;  %v1194_v4 = vpop.f32.mrb[34].mxu1 }
 0x27d   :  { %v1237_v49 = vadd.f32 %v2664_v39, %v1222_v40  ;;  %v1223_v8 = vmax.f32 %v989_v48, %v1194_v4  ;;  %v991_v50 = vpop.f32.mrb[35].mxu0  ;;  %v1196_v51 = vpop.f32.mrb[35].mxu1 }
 0x27f   :  { %v1245_v52 = vmax.f32 %v1237_v49, 0.0  ;;  %v1238_v0 = vadd.f32 %v2664_v39, %v1223_v8 }
 0x281   :  { %1258 = vst.msk [vmem:[#allocation3 + $0x1] sm:$0xff] %vm855_vm3, %v1245_v52  ;;  %v1246_v53 = vmax.f32 %v1238_v0, 0.0 }
 0x283   :  { %1259 = vst.msk [vmem:[#allocation3 + $0x9] sm:$0xff] %vm855_vm3, %v1246_v53 }
 0x28a   :  { %v994_v32 = vpop.f32.mrb[36].mxu0  ;;  %v1199_v33 = vpop.f32.mrb[36].mxu1  ;;  %v1306_v3 = vld [vmem:[#allocation3 + $0x2] ss:$2 sm:$0xff]  ;;  %v1298_v13 = vld [vmem:[#allocation3 + $0x1] ss:$2 sm:$0xff] }
 0x28b   :  { %v1224_v37 = vmax.f32 %v994_v32, %v1199_v33  ;;  %v996_v54 = vpop.f32.mrb[37].mxu0  ;;  %v1201_v55 = vpop.f32.mrb[37].mxu1 }
 0x28c   :  { %v997_v56 = vpop.f32.mrb[38].mxu0  ;;  %v1202_v58 = vpop.f32.mrb[38].mxu1 }
 0x28d   :  { %v1239_v59 = vadd.f32 %v2664_v39, %v1224_v37  ;;  %v1225_v60 = vmax.f32 %v997_v56, %v1202_v58  ;;  %v999_v61 = vpop.f32.mrb[39].mxu0  ;;  %v1204_v62 = vpop.f32.mrb[39].mxu1  ;;  %v1290_v58 = vld [vmem:[#allocation3] ss:$2 sm:$0xff] }
 0x28f   :  { %v1247_v63 = vmax.f32 %v1239_v59, 0.0  ;;  %v1240_v1 = vadd.f32 %v2664_v39, %v1225_v60 }
 0x291   :  { %1260 = vst.msk [vmem:[#allocation3 + $0x11] sm:$0xff] %vm855_vm3, %v1247_v63  ;;  %v1248_v22 = vmax.f32 %v1240_v1, 0.0 }
 0x293   :  { %1261 = vst.msk [vmem:[#allocation3 + $0x19] sm:$0xff] %vm855_vm3, %v1248_v22 }
 0x298   :  { %v1465_v26 = vld [vmem:[#allocation3 + $0x3] ss:$2 sm:$0xff] }
 0x29a   :  { %v1002_v41 = vpop.f32.mrb[40].mxu0  ;;  %v1207_v42 = vpop.f32.mrb[40].mxu1  ;;  %v1467_v45 = vld [vmem:[#allocation3 + $0x13] ss:$2 sm:$0xff]  ;;  %v1308_v5 = vld [vmem:[#allocation3 + $0x12] ss:$2 sm:$0xff] }
 0x29b   :  { %v1226_v6 = vmax.f32 %v1002_v41, %v1207_v42  ;;  %v1004_v7 = vpop.f32.mrb[41].mxu0  ;;  %v1209_v9 = vpop.f32.mrb[41].mxu1  ;;  %v1493_v10 = vpack.c.bf16 %v1467_v45, %v1465_v26  ;;  %v2004_v11 = vpack.i.bf16 %v1308_v5, %v1306_v3  ;;  %v1334_v12 = vpack.c.bf16 %v1308_v5, %v1306_v3  ;;  %v1300_v14 = vld [vmem:[#allocation3 + $0x11] ss:$2 sm:$0xff]  ;;  %v1292_v59 = vld [vmem:[#allocation3 + $0x10] ss:$2 sm:$0xff] }
 0x29c   :  { %v1005_v15 = vpop.f32.mrb[42].mxu0  ;;  %v1210_v35 = vpop.f32.mrb[42].mxu1  ;;  %v1999_v36 = vpack.i.bf16 %v1300_v14, %v1298_v13 }
 0x29d   :  { %v1241_v16 = vadd.f32 %v2664_v39, %v1226_v6  ;;  %v1227_v17 = vmax.f32 %v1005_v15, %v1210_v35  ;;  %v1212_v18 = vpop.f32.mrb[43].mxu1  ;;  %1830 = vmatprep.mubr.msk.bf16.mxu1 %vm855_vm3, %v1493_v10  ;;  %2005 = vrot.lane.b32.xlu1 %v2004_v11, %s2113_s4  ;;  %v1007_v43 = vpop.f32.mrb[43].mxu0  ;;  %v2104_v15 = vld [vmem:[%s2756_s8 + $0x8] sm:$0xff]   ;;  %v2105_v35 = vld [vmem:[%s2756_s8 + $0x10] sm:$0xff]  }
 0x29e   :  { %1828 = vmatprep.mubr.msk.bf16.mxu0 %vm855_vm3, %v1334_v12  ;;  %2000 = vrot.lane.b32.xlu0 %v1999_v36, %s2113_s4  ;;  %v2106_v36 = vld [vmem:[%s2756_s8 + $0x18] sm:$0xff]   ;;  %v2109_v18 = vld [vmem:[%s2756_s8 + $0x30] sm:$0xff]  }
 0x29f   :  { %v1249_v19 = vmax.f32 %v1241_v16, 0.0  ;;  %v1242_v38 = vadd.f32 %v2664_v39, %v1227_v17  ;;  %v2107_v16 = vld [vmem:[%s2756_s8 + $0x20] sm:$0xff]   ;;  %v2108_v17 = vld [vmem:[%s2756_s8 + $0x28] sm:$0xff]   ;;  %v2110_v43 = vld [vmem:[%s2756_s8 + $0x38] sm:$0xff]  }
 0x2a1   :  { %1262 = vst.msk [vmem:[#allocation3 + $0x29] sm:$0xff] %vm855_vm3, %v1249_v19  ;;  %v1250_v20 = vmax.f32 %v1242_v38, 0.0 }
 0x2a3   :  { %1263 = vst.msk [vmem:[#allocation3 + $0x31] sm:$0xff] %vm855_vm3, %v1250_v20  ;;  %v1832_v20 = vld [vmem:[%s2757_s7] ss:$0 sm:$0xff] }
 0x2aa   :  { %v1010_v21 = vpop.f32.mrb[44].mxu0  ;;  %v1215_v23 = vpop.f32.mrb[44].mxu1  ;;  %v1310_v48 = vld [vmem:[#allocation3 + $0x2a] ss:$2 sm:$0xff]  ;;  %v1302_v49 = vld [vmem:[#allocation3 + $0x29] ss:$2 sm:$0xff] }
 0x2ab   :  { %v1228_v24 = vmax.f32 %v1010_v21, %v1215_v23  ;;  %v1012_v27 = vpop.f32.mrb[45].mxu0  ;;  %v1217_v28 = vpop.f32.mrb[45].mxu1  ;;  %v1294_v5 = vld [vmem:[#allocation3 + $0x28] ss:$2 sm:$0xff] }
 0x2ac   :  { %v1013_v30 = vpop.f32.mrb[46].mxu0  ;;  %v1218_v25 = vpop.f32.mrb[46].mxu1 }
 0x2ad   :  { %v1243_v29 = vadd.f32 %v2664_v39, %v1228_v24  ;;  %v1229_v57 = vmax.f32 %v1013_v30, %v1218_v25  ;;  %v1015_v31 = vpop.f32.mrb[47].mxu0  ;;  %v1220_v34 = vpop.f32.mrb[47].mxu1 }
 0x2af   :  { %v1251_v40 = vmax.f32 %v1243_v29, 0.0  ;;  %v1244_v44 = vadd.f32 %v2664_v39, %v1229_v57 }
 0x2b1   :  { %1264 = vst.msk [vmem:[#allocation3 + $0x39] sm:$0xff] %vm855_vm3, %v1251_v40  ;;  %v1252_v46 = vmax.f32 %v1244_v44, 0.0 }
 0x2b3   :  { %1265 = vst.msk [vmem:[#allocation3 + $0x41] sm:$0xff] %vm855_vm3, %v1252_v46 }
 0x2b8   :  { %v1469_v63 = vld [vmem:[#allocation3 + $0x2b] ss:$2 sm:$0xff] }
 0x2ba   :  { %v1312_v4 = vld [vmem:[#allocation3 + $0x3a] ss:$2 sm:$0xff]  ;;  %v1304_v8 = vld [vmem:[#allocation3 + $0x39] ss:$2 sm:$0xff] }
 0x2bb   :  { %v2014_v50 = vpack.i.bf16 %v1312_v4, %v1310_v48  ;;  %v1336_v51 = vpack.c.bf16 %v1312_v4, %v1310_v48  ;;  %v2009_v52 = vpack.i.bf16 %v1304_v8, %v1302_v49  ;;  %v1471_v54 = vld [vmem:[#allocation3 + $0x3b] ss:$2 sm:$0xff]  ;;  %v1296_v6 = vld [vmem:[#allocation3 + $0x38] ss:$2 sm:$0xff] }
 0x2bc   :  { %v1495_v22 = vpack.c.bf16 %v1471_v54, %v1469_v63 }
 0x2bd   :  { %2015 = vrot.lane.b32.xlu1 %v2014_v50, %s2113_s4  ;;  %2010 = vrot.lane.b32.xlu0 %v2009_v52, %s2113_s4 }
 0x30f   :  { %v2006_v0 = vpop.permute.xlu1 %2005 }
 0x310   :  { %v2008_v53 = vunpack.i.h.bf16 %v2006_v0  ;;  %v2007_v32 = vunpack.i.l.bf16 %v2006_v0  ;;  %v2001_v39 = vpop.permute.xlu0 %2000 }
 0x311   :  { %v2003_v33 = vunpack.i.h.bf16 %v2001_v39  ;;  %v2002_v37 = vunpack.i.l.bf16 %v2001_v39 }
 0x312   :  { %v1488_v55 = vsel %vm855_vm3, %v1298_v13, %v2007_v32  ;;  %v1489_v56 = vsel %vm855_vm3, %v1300_v14, %v2008_v53  ;;  %v2103_v14 = vld [vmem:[%s2756_s8] sm:$0xff]  }
 0x313   :  { %v1492_v60 = vpack.c.bf16 %v1489_v56, %v1488_v55  ;;  %v1329_v61 = vsel %vm855_vm3, %v1290_v58, %v2002_v37  ;;  %v1330_v62 = vsel %vm855_vm3, %v1292_v59, %v2003_v33 }
 0x314   :  { %v1333_v1 = vpack.c.bf16 %v1330_v62, %v1329_v61 }
 0x315   :  { %1535 = vmatmul.mubr.bf16.vlgmr.msra.gmra.mrb[48].mxu1 %v1492_v60 }
 0x316   :  { %1448 = vmatmul.mubr.bf16.vlgmr.msra.gmra.mrb[48].mxu0 %v1333_v1  ;;  %1831 = vmatprep.mubr.msk.bf16.mxu1 %vm855_vm3, %v1495_v22 }
 0x317   :  { %1829 = vmatprep.mubr.msk.bf16.mxu0 %vm855_vm3, %v1336_v51  ;;  %1854 = vmatpush3.bf16.msra.mxu0 %v2103_v14 }
 0x318   :  { %1855 = vmatprep.subr.bf16.mxu0 %v2112_v47 }
 0x31b   :  { %1856 = vmatpush3.bf16.msra.mxu0 %v2104_v15  ;;  %v1842_v15 = vld [vmem:[%s2760_s10] ss:$0 sm:$0xff] }
 0x31c   :  { %1857 = vmatprep.subr.bf16.mxu0 %v2112_v47 }
 0x31f   :  { %1858 = vmatpush3.bf16.msra.mxu0 %v2105_v35 }
 0x320   :  { %1859 = vmatprep.subr.bf16.mxu0 %v2112_v47 }
 0x323   :  { %1860 = vmatpush3.bf16.msra.mxu0 %v2106_v36 }
 0x324   :  { %1861 = vmatprep.subr.bf16.mxu0 %v2112_v47 }
 0x327   :  { %1862 = vmatpush3.bf16.msra.mxu0 %v2107_v16 }
 0x328   :  { %1863 = vmatprep.subr.bf16.mxu0 %v2112_v47 }
 0x32b   :  { %1864 = vmatpush3.bf16.msra.mxu0 %v2108_v17 }
 0x32c   :  { %1865 = vmatprep.subr.bf16.mxu0 %v2112_v47 }
 0x32f   :  { %v2016_v2 = vpop.permute.xlu1 %2015  ;;  %v2011_v26 = vpop.permute.xlu0 %2010  ;;  %1866 = vmatpush3.bf16.msra.mxu0 %v2109_v18 }
 0x330   :  { %v2018_v3 = vunpack.i.h.bf16 %v2016_v2  ;;  %v2017_v41 = vunpack.i.l.bf16 %v2016_v2  ;;  %v2013_v42 = vunpack.i.h.bf16 %v2011_v26  ;;  %v2012_v45 = vunpack.i.l.bf16 %v2011_v26  ;;  %1867 = vmatprep.subr.bf16.mxu0 %v2112_v47 }
 0x332   :  { %v1331_v7 = vsel %vm855_vm3, %v1294_v5, %v2012_v45  ;;  %v1332_v9 = vsel %vm855_vm3, %v1296_v6, %v2013_v42  ;;  %v1490_v10 = vsel %vm855_vm3, %v1302_v49, %v2017_v41  ;;  %v1491_v11 = vsel %vm855_vm3, %v1304_v8, %v2018_v3 }
 0x333   :  { %v1335_v12 = vpack.c.bf16 %v1332_v9, %v1331_v7  ;;  %v1494_v13 = vpack.c.bf16 %v1491_v11, %v1490_v10  ;;  %1868 = vmatpush3.bf16.msra.mxu0 %v2110_v43  ;;  %v17_v9 = vstv %s2758_s11  ;;  %v1833_v10 = vld [vmem:[%s2759_s9] ss:$0 sm:$0xff] }
 0x334   :  { %18 = vst [vmem:[#allocation4] sm:$0x1] %v17_v9 }
 0x335   :  { %1456 = vmatmul.mubr.bf16.gmra.mrb[52].mxu0 %v1335_v12  ;;  %1543 = vmatmul.mubr.bf16.gmra.mrb[52].mxu1 %v1494_v13 }
 0x336   :  { %1869 = vmatprep.mubr.msk.bf16.mxu0 %vm2116_vm5, %v2112_v47 }
 0x33b   :  { %v1843_v18 = vld [vmem:[#allocation4] ss:$0 sm:$0xff] }
 0x3e8   :  { %v1536_v19 = vpop.f32.mrb[48].mxu1 }
 0x3e9   :  { %v1449_v38 = vpop.f32.mrb[48].mxu0  ;;  %v1538_v21 = vpop.f32.mrb[49].mxu1 }
 0x3ea   :  { %v1551_v23 = vmax.f32 %v1449_v38, %v1536_v19  ;;  %v1451_v24 = vpop.f32.mrb[49].mxu0  ;;  %v1539_v27 = vpop.f32.mrb[50].mxu1 }
 0x3eb   :  { %v1452_v28 = vpop.f32.mrb[50].mxu0  ;;  %v1541_v30 = vpop.f32.mrb[51].mxu1 }
 0x3ec   :  { %v1562_v25 = vadd.f32 %v1832_v20, %v1551_v23  ;;  %v1552_v29 = vmax.f32 %v1452_v28, %v1539_v27  ;;  %v1454_v57 = vpop.f32.mrb[51].mxu0 }
 0x3ee   :  { %v1563_v31 = vadd.f32 %v1832_v20, %v1552_v29  ;;  %v1566_v34 = vmax.f32 %v1562_v25, 0.0 }
 0x3f0   :  { %v1567_v40 = vmax.f32 %v1563_v31, 0.0 }
 0x3f2   :  { %v1570_v47 = vadd.f32 %v1567_v40, %v1566_v34 }
 0x3f4   :  { %v1571_v44 = vrot.slane %v1570_v47, 4 }
 0x3f6   :  { %v1572_v46 = vadd.f32 %v1571_v44, %v1570_v47 }
 0x3f8   :  { %v1573_v0 = vrot.slane %v1572_v46, 2 }
 0x3fa   :  { %v1574_v54 = vadd.f32 %v1573_v0, %v1572_v46 }
 0x3fc   :  { %v1575_v59 = vrot.slane %v1574_v54, 1 }
 0x3fe   :  { %v1576_v62 = vadd.f32 %v1575_v59, %v1574_v54 }
 0x400   :  { %v1584_v22 = vmul.f32 0.0625, %v1576_v62 }
 0x402   :  { %v1586_v3 = vpack.c.bf16 %v1584_v22, %v1584_v22 }
 0x404   :  { %v1613_v45 = vunpack.c.l.b16 %v1586_v3 }
 0x408   :  { %v1457_v48 = vpop.f32.mrb[52].mxu0  ;;  %v1544_v4 = vpop.f32.mrb[52].mxu1 }
 0x409   :  { %v1553_v49 = vmax.f32 %v1457_v48, %v1544_v4  ;;  %v1459_v8 = vpop.f32.mrb[53].mxu0  ;;  %v1546_v50 = vpop.f32.mrb[53].mxu1 }
 0x40a   :  { %v1460_v51 = vpop.f32.mrb[54].mxu0  ;;  %v1547_v52 = vpop.f32.mrb[54].mxu1 }
 0x40b   :  { %v1564_v53 = vadd.f32 %v1832_v20, %v1553_v49  ;;  %v1554_v32 = vmax.f32 %v1460_v51, %v1547_v52  ;;  %v1462_v39 = vpop.f32.mrb[55].mxu0  ;;  %v1549_v33 = vpop.f32.mrb[55].mxu1 }
 0x40d   :  { %v1565_v37 = vadd.f32 %v1832_v20, %v1554_v32  ;;  %v1568_v55 = vmax.f32 %v1564_v53, 0.0 }
 0x40f   :  { %v1569_v56 = vmax.f32 %v1565_v37, 0.0 }
 0x411   :  { %v1577_v58 = vadd.f32 %v1569_v56, %v1568_v55 }
 0x413   :  { %v1578_v60 = vrot.slane %v1577_v58, 4 }
 0x415   :  { %v1579_v61 = vadd.f32 %v1578_v60, %v1577_v58 }
 0x417   :  { %v1580_v63 = vrot.slane %v1579_v61, 2 }
 0x419   :  { %v1581_v1 = vadd.f32 %v1580_v63, %v1579_v61 }
 0x41b   :  { %v1582_v2 = vrot.slane %v1581_v1, 1 }
 0x41d   :  { %v1583_v26 = vadd.f32 %v1582_v2, %v1581_v1 }
 0x41f   :  { %v1585_v41 = vmul.f32 0.0625, %v1583_v26 }
 0x421   :  { %v1587_v42 = vpack.c.bf16 %v1585_v41, %v1585_v41 }
 0x423   :  { %v1614_v5 = vunpack.c.l.b16 %v1587_v42 }
 0x425   :  { %v1616_v6 = vsel %vm1615_vm6, %v1614_v5, %v1613_v45 }
 0x426   :  { %v1617_v7 = vpack.c.b16 %v1616_v6, %v1616_v6 }
 0x428   :  { %1870 = vmatmul.mubr.bf16.vlgmr.msra.gmra.mrb[56].mxu0 %v1617_v7 }
 0x4fb   :  { %v1701_v11 = vpop.f32.mrb[56].mxu0 }
 0x4fc   :  { %v1702_v12 = vadd.f32 %v1833_v10, %v1701_v11  ;;  %v1871_v13 = vpop.f32.mrb[57].mxu0 }
 0x4fd   :  { %v1704_v14 = vpop.f32.mrb[58].mxu0 }
 0x4fe   :  { %v1707_v35 = vmax.f32 %v1702_v12, 0.0  ;;  %v1872_v36 = vpop.f32.mrb[59].mxu0 }
 0x500   :  { %v1715_v16 = vmul.f32 %v1842_v15, %v1707_v35 }
 0x502   :  { %v1717_v17 = vsel %vm1716_vm7, %v1715_v16, 0.0 }
 0x503   :  { %1718 = vadd.xlane.f32.xlu0 %v1717_v17 }
 0x590   :  { %v1719_v43 = vpop.xlane.xlu0 %1718 }
 0x591   :  { %v1727_v19 = vadd.f32 %v1843_v18, %v1719_v43 }
 0x593   :  { %1729 = vst.msk [vmem:[%s2761_s12] sm:$0x3] %vm1728_vm8, %v1727_v19 }

</bundles_post_ra>
